<compile_context>
chip_gen: v5e
topology: v5e:2x2
jax: 0.10.0
libtpu: 0.0.40
codegen_flags: <defaults>
</compile_context>

<pallas_src>
import functools

import jax
import jax.numpy as jnp
from jax.experimental import pallas as pl
from jax.experimental.pallas import tpu as pltpu

# ----------------------------- model config ---------------------------------
BERT_HIDDEN_SIZE = 32          # scaled down from 768
N_SENTIMENT_CLASSES = 5
NUM_LAYERS = 2
NUM_HEADS = 2
HEAD_DIM = BERT_HIDDEN_SIZE // NUM_HEADS
INTERMEDIATE = 4 * BERT_HIDDEN_SIZE
VOCAB = 100
MAX_POS = 64
LN_EPS = 1e-12
MM_DTYPE = jnp.bfloat16        # matmul-operand dtype (f32 accumulation everywhere)
OUT_LANES = 128                # lane-dense padded output width


# ------------------------------ small helpers --------------------------------

def _layernorm(x, g, b):
    mu = jnp.mean(x, axis=-1, keepdims=True)
    var = jnp.mean((x - mu) ** 2, axis=-1, keepdims=True)
    return (x - mu) * jax.lax.rsqrt(var + LN_EPS) * g + b


def _mm(a, b):
    """MXU matmul with bf16 operands, f32 accumulation."""
    return jnp.dot(a.astype(MM_DTYPE), b.astype(MM_DTYPE),
                   preferred_element_type=jnp.float32)


def _select_rows(x, n_rows, start, step):
    """Pick rows start, start+step, ... via a one-hot matmul (avoids strided
    sublane slicing inside the kernel)."""
    n = x.shape[0]
    col = jax.lax.broadcasted_iota(jnp.int32, (n_rows, n), 1)
    row = jax.lax.broadcasted_iota(jnp.int32, (n_rows, n), 0)
    sel = (col == start + row * step).astype(jnp.float32)
    return jnp.dot(sel, x, preferred_element_type=jnp.float32)


# ------------------------- fused encoder body (in-kernel) --------------------

def _encoder(x_ref, mask_ref, lnslab_ref, qkvw_ref, qkvb_ref, wo_ref, bo_ref,
             fw1_ref, fb1_ref, fw2_ref, fb2_ref):
    """Embedding LN + NUM_LAYERS transformer layers on the flattened (N, H) slab.

    Parameter stacking (leading-axis views, no lane-offset slices):
      qkvw/qkvb index = li*3*NH + t*NH + h   (t: 0=q, 1=k, 2=v)
      wo index        = li*NH + h
      lnslab rows     = [emb_g, emb_b] + per layer [ln1_g, ln1_b, ln2_g, ln2_b]
    """
    NH, D = NUM_HEADS, HEAD_DIM
    scale = 1.0 / (D ** 0.5)

    x = x_ref[...].astype(jnp.float32)                        # (N, H)
    mask = mask_ref[...]                                      # (N, N) additive
    x = _layernorm(x, lnslab_ref[0], lnslab_ref[1])           # embedding LN

    for li in range(NUM_LAYERS):                              # static unroll (L=2)
        x_mm = x.astype(MM_DTYPE)
        attn = bo_ref[li]                                     # (1, H), broadcasts
        base = li * 3 * NH
        for h in range(NH):                                   # static unroll (NH=2)
            qh = _mm(x_mm, qkvw_ref[base + h]) + qkvb_ref[base + h]
            kh = _mm(x_mm, qkvw_ref[base + NH + h]) + qkvb_ref[base + NH + h]
            vh = _mm(x_mm, qkvw_ref[base + 2 * NH + h]) + qkvb_ref[base + 2 * NH + h]
            s = jax.lax.dot_general(
                qh.astype(MM_DTYPE), kh.astype(MM_DTYPE),
                (((1,), (1,)), ((), ())),
                preferred_element_type=jnp.float32) * scale + mask
            s = s - jnp.max(s, axis=-1, keepdims=True)
            p = jnp.exp(s)
            # TODO(synk): approx reciprocal -> softmax normalized to ~1e-3 rel tol.
            p = p * pl.reciprocal(jnp.sum(p, axis=-1, keepdims=True), approx=True)
            ctx = _mm(p, vh)                                  # (N, D)
            attn = attn + _mm(ctx, wo_ref[li * NH + h])       # accumulate Wo per head
        ln = 2 + 4 * li
        h1 = _layernorm(x + attn, lnslab_ref[ln], lnslab_ref[ln + 1])
        # TODO(synk): HF BERT uses exact erf GELU; tanh approximation used here.
        ffn = jax.nn.gelu(_mm(h1, fw1_ref[li]) + fb1_ref[li], approximate=True)
        ffn = _mm(ffn, fw2_ref[li]) + fb2_ref[li]
        x = _layernorm(h1 + ffn, lnslab_ref[ln + 2], lnslab_ref[ln + 3])
    return x                                                  # (N, H)


# --------------------------- fused task kernels -------------------------------

def _sst_kernel(x_ref, mask_ref, lnslab_ref, qkvw_ref, qkvb_ref, wo_ref, bo_ref,
                fw1_ref, fb1_ref, fw2_ref, fb2_ref,
                pcw_ref, pcb_ref,
                sw1_ref, sb1_ref, sw2_ref, sb2_ref, sw3_ref, sb3_ref,
                sw4_ref, sb4_ref, o_ref):
    B = o_ref.shape[0]
    S = x_ref.shape[0] // B
    x = _encoder(x_ref, mask_ref, lnslab_ref, qkvw_ref, qkvb_ref, wo_ref, bo_ref,
                 fw1_ref, fb1_ref, fw2_ref, fb2_ref)
    cls = _select_rows(x, B, 0, S)                            # CLS hidden states (B, H)
    # TODO(synk): nn.Dropout(hidden_dropout_prob) is identity in eval; skipped.
    pooled = jnp.tanh(_mm(cls, pcw_ref[0]) + pcb_ref[0])      # BERT pooler
    xh = jnp.tanh(_mm(pooled, pcw_ref[1]) + pcb_ref[1])       # common + Tanh
    xh = _mm(xh, sw1_ref[...]) + sb1_ref[...]
    xh = _mm(xh, sw2_ref[...]) + sb2_ref[...]
    xh = _mm(xh, sw3_ref[...]) + sb3_ref[...]
    # Final weight is zero-padded to 128 lanes -> lane-dense (B, 128) store.
    o_ref[...] = (_mm(xh, sw4_ref[...]) + sb4_ref[...]).astype(o_ref.dtype)


def _pair_kernel(x_ref, mask_ref, lnslab_ref, qkvw_ref, qkvb_ref, wo_ref, bo_ref,
                 fw1_ref, fb1_ref, fw2_ref, fb2_ref,
                 pcw_ref, pcb_ref, tw_ref, tb_ref, hw_ref, hb_ref, o_ref):
    B = o_ref.shape[0]
    S2 = x_ref.shape[0] // (2 * B)                            # concatenated seq length
    x = _encoder(x_ref, mask_ref, lnslab_ref, qkvw_ref, qkvb_ref, wo_ref, bo_ref,
                 fw1_ref, fb1_ref, fw2_ref, fb2_ref)
    cls_a = _select_rows(x, B, 0, S2)                         # CLS of (s1||s2)
    cls_b = _select_rows(x, B, B * S2, S2)                    # CLS of (s2||s1)
    h1 = jnp.tanh(_mm(cls_a, pcw_ref[0]) + pcb_ref[0])        # pooler outputs
    h2 = jnp.tanh(_mm(cls_b, pcw_ref[0]) + pcb_ref[0])
    h3 = h1 - h2
    # Branch 1 applies Tanh after `common`; branches 2/3 do not (matches PyTorch spec).
    c1 = jnp.tanh(_mm(h1, pcw_ref[1]) + pcb_ref[1])
    c2 = _mm(h2, pcw_ref[1]) + pcb_ref[1]
    c3 = _mm(h3, pcw_ref[1]) + pcb_ref[1]
    l1 = jnp.maximum(_mm(c1, tw_ref[0]) + tb_ref[0], 0.0)     # (B, 128) lane-padded
    l2 = jnp.maximum(_mm(c2, tw_ref[1]) + tb_ref[1], 0.0)
    l3 = jnp.maximum(_mm(c3, tw_ref[2]) + tb_ref[2], 0.0)
    hw = hw_ref[...]                                          # (3, 1)
    o_ref[...] = (l1 * hw[0:1, :] + l2 * hw[1:2, :] + l3 * hw[2:3, :]
                  + hb_ref[...]).astype(o_ref.dtype)


def _fused_call(kernel, inputs, out_rows):
    """Single-program pallas_call; every operand is one whole VMEM block.
    At B=2 a single program wins; for large B re-introduce a 'parallel' batch
    grid axis so v7x's two TensorCores split the work."""
    out_shape = jax.ShapeDtypeStruct((out_rows, OUT_LANES), jnp.float32)
    return pl.pallas_call(
        kernel,
        grid=(1,),
        out_shape=out_shape,
        in_specs=[pl.BlockSpec(a.shape, lambda i, nd=a.ndim: (0,) * nd)
                  for a in inputs],
        out_specs=pl.BlockSpec(out_shape.shape, lambda i: (0, 0)),
        compiler_params=pltpu.CompilerParams(dimension_semantics=("arbitrary",)),
    )(*inputs)


# ----------------------------- parameter init --------------------------------

def init_params(key):
    keys = iter(jax.random.split(key, 64))

    def nrm(shape, scale=0.02):
        return scale * jax.random.normal(next(keys), shape, dtype=jnp.float32)

    H, I, NH, D = BERT_HIDDEN_SIZE, INTERMEDIATE, NUM_HEADS, HEAD_DIM
    p = {
        "word_emb": nrm((VOCAB, H)),
        "pos_emb": nrm((MAX_POS, H)),
        "tok_emb": nrm((2, H)),
        "emb_ln_g": jnp.ones((1, H), jnp.float32),
        "emb_ln_b": jnp.zeros((1, H), jnp.float32),
        "layers": [],
        "pooler_w": nrm((H, H)), "pooler_b": jnp.zeros((1, H), jnp.float32),
        "common_w": nrm((H, H)), "common_b": jnp.zeros((1, H), jnp.float32),
        "sst_w1": nrm((H, 2 * H)), "sst_b1": jnp.zeros((1, 2 * H), jnp.float32),
        "sst_w2": nrm((2 * H, H)), "sst_b2": jnp.zeros((1, H), jnp.float32),
        "sst_w3": nrm((H, H // 2)), "sst_b3": jnp.zeros((1, H // 2), jnp.float32),
        "sst_w4": nrm((H // 2, N_SENTIMENT_CLASSES)),
        "sst_b4": jnp.zeros((1, N_SENTIMENT_CLASSES), jnp.float32),
    }
    for task in ("para", "sts"):
        p[f"{task}_w"] = nrm((3, H, 1))                    # three (H,1) classifier linears
        p[f"{task}_b"] = jnp.zeros((3, 1, 1), jnp.float32)
        p[f"{task}_head_w"] = nrm((3, 1))                  # Linear(3, 1)
        p[f"{task}_head_b"] = jnp.zeros((1, 1), jnp.float32)
    for _ in range(NUM_LAYERS):
        p["layers"].append({
            "wq": nrm((NH, H, D)), "bq": jnp.zeros((NH, 1, D), jnp.float32),
            "wk": nrm((NH, H, D)), "bk": jnp.zeros((NH, 1, D), jnp.float32),
            "wv": nrm((NH, H, D)), "bv": jnp.zeros((NH, 1, D), jnp.float32),
            "wo": nrm((NH, D, H)), "bo": jnp.zeros((1, H), jnp.float32),
            "ln1_g": jnp.ones((1, H), jnp.float32), "ln1_b": jnp.zeros((1, H), jnp.float32),
            "w1": nrm((H, I)), "b1": jnp.zeros((1, I), jnp.float32),
            "w2": nrm((I, H)), "b2": jnp.zeros((1, H), jnp.float32),
            "ln2_g": jnp.ones((1, H), jnp.float32), "ln2_b": jnp.zeros((1, H), jnp.float32),
        })
    return p


def _pad_lanes(a, width=OUT_LANES):
    pad = [(0, 0)] * (a.ndim - 1) + [(0, width - a.shape[-1])]
    return jnp.pad(a, pad)


def pack_params(p):
    """Stack the per-layer weights into a few large kernel operands (bf16 for
    matmul weights, f32 for biases / LN)."""
    mm = MM_DTYPE
    layers = p["layers"]
    pk = {
        "word_emb": p["word_emb"], "pos_emb": p["pos_emb"], "tok_emb": p["tok_emb"],
        "qkvw": jnp.concatenate([lp[t] for lp in layers for t in ("wq", "wk", "wv")],
                                axis=0).astype(mm),                       # (L*3*NH, H, D)
        "qkvb": jnp.concatenate([lp["b" + t[-1]] for lp in layers
                                 for t in ("wq", "wk", "wv")], axis=0),   # (L*3*NH, 1, D)
        "wo": jnp.concatenate([lp["wo"] for lp in layers], axis=0).astype(mm),  # (L*NH, D, H)
        "bo": jnp.stack([lp["bo"] for lp in layers], axis=0),             # (L, 1, H)
        "lnslab": jnp.stack([p["emb_ln_g"], p["emb_ln_b"]]
                            + [lp[k] for lp in layers
                               for k in ("ln1_g", "ln1_b", "ln2_g", "ln2_b")],
                            axis=0),                                      # (2+4L, 1, H)
        "fw1": jnp.stack([lp["w1"] for lp in layers], axis=0).astype(mm), # (L, H, I)
        "fb1": jnp.stack([lp["b1"] for lp in layers], axis=0),            # (L, 1, I)
        "fw2": jnp.stack([lp["w2"] for lp in layers], axis=0).astype(mm), # (L, I, H)
        "fb2": jnp.stack([lp["b2"] for lp in layers], axis=0),            # (L, 1, H)
        "pcw": jnp.stack([p["pooler_w"], p["common_w"]], axis=0).astype(mm),  # (2, H, H)
        "pcb": jnp.stack([p["pooler_b"], p["common_b"]], axis=0),         # (2, 1, H)
        "sw1": p["sst_w1"].astype(mm), "sb1": p["sst_b1"],
        "sw2": p["sst_w2"].astype(mm), "sb2": p["sst_b2"],
        "sw3": p["sst_w3"].astype(mm), "sb3": p["sst_b3"],
        "sw4": _pad_lanes(p["sst_w4"]).astype(mm),                        # (H/2, 128)
        "sb4": _pad_lanes(p["sst_b4"]),                                   # (1, 128)
    }
    for task in ("para", "sts"):
        pk[f"{task}_tw"] = _pad_lanes(p[f"{task}_w"]).astype(mm)          # (3, H, 128)
        pk[f"{task}_tb"] = _pad_lanes(p[f"{task}_b"])                     # (3, 1, 128)
        pk[f"{task}_hw"] = p[f"{task}_head_w"]                            # (3, 1)
        pk[f"{task}_hb"] = p[f"{task}_head_b"]                            # (1, 1)
    return pk


# ---------------------------- wrapper-side prep -------------------------------

def _embed(pk, input_ids):
    """Word + position + token-type(0) embeddings, flattened to (B*S, H)."""
    B, S = input_ids.shape
    # TODO(synk): embedding-table gather / checkpoint loading stay in plain JAX.
    emb = (pk["word_emb"][input_ids]
           + pk["pos_emb"][:S][None, :, :]
           + pk["tok_emb"][0][None, None, :])   # token_type_ids default to 0, as in the reference
    return emb.reshape(B * S, BERT_HIDDEN_SIZE)


def _block_diag_mask(attention_mask):
    """Additive (N, N) mask: -1e4 for padded keys and cross-sequence positions."""
    B, S = attention_mask.shape
    n = B * S
    seq_id = jnp.arange(n, dtype=jnp.int32) // S
    same_seq = seq_id[:, None] == seq_id[None, :]
    key_valid = (attention_mask.reshape(n) > 0)[None, :]
    return jnp.where(same_seq & key_valid, 0.0, -10000.0).astype(jnp.float32)


def _encoder_operands(pk):
    return (pk["lnslab"], pk["qkvw"], pk["qkvb"], pk["wo"], pk["bo"],
            pk["fw1"], pk["fb1"], pk["fw2"], pk["fb2"])


# ------------------------------- task heads -----------------------------------

def predict_sentiment(pk, input_ids, attention_mask):
    B = input_ids.shape[0]
    ins = [_embed(pk, input_ids), _block_diag_mask(attention_mask),
           *_encoder_operands(pk), pk["pcw"], pk["pcb"],
           pk["sw1"], pk["sb1"], pk["sw2"], pk["sb2"], pk["sw3"], pk["sb3"],
           pk["sw4"], pk["sb4"]]
    out = _fused_call(_sst_kernel, ins, B)
    return out[:, :N_SENTIMENT_CLASSES]


def _pair_forward(pk, task, ids1, m1, ids2, m2):
    B = ids1.shape[0]
    # Both sentence orderings go through the encoder in ONE fused pass (2B seqs).
    ids = jnp.concatenate((jnp.concatenate((ids1, ids2), axis=1),
                           jnp.concatenate((ids2, ids1), axis=1)), axis=0)
    masks = jnp.concatenate((jnp.concatenate((m1, m2), axis=1),
                             jnp.concatenate((m2, m1), axis=1)), axis=0)
    ins = [_embed(pk, ids), _block_diag_mask(masks),
           *_encoder_operands(pk), pk["pcw"], pk["pcb"],
           pk[f"{task}_tw"], pk[f"{task}_tb"], pk[f"{task}_hw"], pk[f"{task}_hb"]]
    out = _fused_call(_pair_kernel, ins, B)
    return out[:, :1]


def predict_paraphrase(pk, ids1, m1, ids2, m2):
    return _pair_forward(pk, "para", ids1, m1, ids2, m2)


def predict_similarity(pk, ids1, m1, ids2, m2):
    return _pair_forward(pk, "sts", ids1, m1, ids2, m2)


# ----------------------------------- main --------------------------------------

if __name__ == "__main__":
    key = jax.random.PRNGKey(0)
    k_params, k_ids1, k_ids2 = jax.random.split(key, 3)
    packed = pack_params(init_params(k_params))

    B, S = 2, 8
    input_ids_1 = jax.random.randint(k_ids1, (B, S), 0, VOCAB, dtype=jnp.int32)
    input_ids_2 = jax.random.randint(k_ids2, (B, S), 0, VOCAB, dtype=jnp.int32)
    attn_mask_1 = jnp.ones((B, S), jnp.int32)
    attn_mask_2 = jnp.ones((B, S), jnp.int32).at[:, S - 2:].set(0)  # some padding

    sent_fn = jax.jit(functools.partial(predict_sentiment, packed))
    para_fn = jax.jit(functools.partial(predict_paraphrase, packed))
    sts_fn = jax.jit(functools.partial(predict_similarity, packed))

    sst_logits = sent_fn(input_ids_1, attn_mask_1)
    para_logits = para_fn(input_ids_1, attn_mask_1, input_ids_2, attn_mask_2)
    sts_logits = sts_fn(input_ids_1, attn_mask_1, input_ids_2, attn_mask_2)

    jax.block_until_ready((sst_logits, para_logits, sts_logits))

    assert sst_logits.shape == (B, N_SENTIMENT_CLASSES)
    assert para_logits.shape == (B, 1)
    assert sts_logits.shape == (B, 1)
    assert bool(jnp.all(jnp.isfinite(sst_logits)))
    assert bool(jnp.all(jnp.isfinite(para_logits)))
    assert bool(jnp.all(jnp.isfinite(sts_logits)))
    print("KERNEL_OK")
</pallas_src>

<mosaic_0001>
module attributes {stable_mosaic.version = 11 : i64} {
  func.func @_sst_kernel(%arg0: i32, %arg1: memref<16x32xf32, #tpu.memory_space<vmem>>, %arg2: memref<16x16xf32, #tpu.memory_space<vmem>>, %arg3: memref<10x1x32xf32, #tpu.memory_space<vmem>>, %arg4: memref<12x32x16xbf16, #tpu.memory_space<vmem>>, %arg5: memref<12x1x16xf32, #tpu.memory_space<vmem>>, %arg6: memref<4x16x32xbf16, #tpu.memory_space<vmem>>, %arg7: memref<2x1x32xf32, #tpu.memory_space<vmem>>, %arg8: memref<2x32x128xbf16, #tpu.memory_space<vmem>>, %arg9: memref<2x1x128xf32, #tpu.memory_space<vmem>>, %arg10: memref<2x128x32xbf16, #tpu.memory_space<vmem>>, %arg11: memref<2x1x32xf32, #tpu.memory_space<vmem>>, %arg12: memref<2x32x32xbf16, #tpu.memory_space<vmem>>, %arg13: memref<2x1x32xf32, #tpu.memory_space<vmem>>, %arg14: memref<32x64xbf16, #tpu.memory_space<vmem>>, %arg15: memref<1x64xf32, #tpu.memory_space<vmem>>, %arg16: memref<64x32xbf16, #tpu.memory_space<vmem>>, %arg17: memref<1x32xf32, #tpu.memory_space<vmem>>, %arg18: memref<32x16xbf16, #tpu.memory_space<vmem>>, %arg19: memref<1x16xf32, #tpu.memory_space<vmem>>, %arg20: memref<16x128xbf16, #tpu.memory_space<vmem>>, %arg21: memref<1x128xf32, #tpu.memory_space<vmem>>, %arg22: memref<2x128xf32, #tpu.memory_space<vmem>>) attributes {dimension_semantics = [#tpu.dimension_semantics<arbitrary>], iteration_bounds = array<i64: 1>, scalar_prefetch = 0 : i64, scratch_operands = 0 : i64, tpu.core_type = #tpu.core_type<tc>, window_params = [{pipeline_mode = #tpu.pipeline_mode<synchronous>, transform_indices = @transform_0, window_bounds = array<i64: 16, 32>}, {pipeline_mode = #tpu.pipeline_mode<synchronous>, transform_indices = @transform_1, window_bounds = array<i64: 16, 16>}, {pipeline_mode = #tpu.pipeline_mode<synchronous>, transform_indices = @transform_2, window_bounds = array<i64: 10, 1, 32>}, {pipeline_mode = #tpu.pipeline_mode<synchronous>, transform_indices = @transform_3, window_bounds = array<i64: 12, 32, 16>}, {pipeline_mode = #tpu.pipeline_mode<synchronous>, transform_indices = @transform_4, window_bounds = array<i64: 12, 1, 16>}, {pipeline_mode = #tpu.pipeline_mode<synchronous>, transform_indices = @transform_5, window_bounds = array<i64: 4, 16, 32>}, {pipeline_mode = #tpu.pipeline_mode<synchronous>, transform_indices = @transform_6, window_bounds = array<i64: 2, 1, 32>}, {pipeline_mode = #tpu.pipeline_mode<synchronous>, transform_indices = @transform_7, window_bounds = array<i64: 2, 32, 128>}, {pipeline_mode = #tpu.pipeline_mode<synchronous>, transform_indices = @transform_8, window_bounds = array<i64: 2, 1, 128>}, {pipeline_mode = #tpu.pipeline_mode<synchronous>, transform_indices = @transform_9, window_bounds = array<i64: 2, 128, 32>}, {pipeline_mode = #tpu.pipeline_mode<synchronous>, transform_indices = @transform_10, window_bounds = array<i64: 2, 1, 32>}, {pipeline_mode = #tpu.pipeline_mode<synchronous>, transform_indices = @transform_11, window_bounds = array<i64: 2, 32, 32>}, {pipeline_mode = #tpu.pipeline_mode<synchronous>, transform_indices = @transform_12, window_bounds = array<i64: 2, 1, 32>}, {pipeline_mode = #tpu.pipeline_mode<synchronous>, transform_indices = @transform_13, window_bounds = array<i64: 32, 64>}, {pipeline_mode = #tpu.pipeline_mode<synchronous>, transform_indices = @transform_14, window_bounds = array<i64: 1, 64>}, {pipeline_mode = #tpu.pipeline_mode<synchronous>, transform_indices = @transform_15, window_bounds = array<i64: 64, 32>}, {pipeline_mode = #tpu.pipeline_mode<synchronous>, transform_indices = @transform_16, window_bounds = array<i64: 1, 32>}, {pipeline_mode = #tpu.pipeline_mode<synchronous>, transform_indices = @transform_17, window_bounds = array<i64: 32, 16>}, {pipeline_mode = #tpu.pipeline_mode<synchronous>, transform_indices = @transform_18, window_bounds = array<i64: 1, 16>}, {pipeline_mode = #tpu.pipeline_mode<synchronous>, transform_indices = @transform_19, window_bounds = array<i64: 16, 128>}, {pipeline_mode = #tpu.pipeline_mode<synchronous>, transform_indices = @transform_20, window_bounds = array<i64: 1, 128>}, {pipeline_mode = #tpu.pipeline_mode<synchronous>, transform_indices = @transform_21, window_bounds = array<i64: 2, 128>}]} {
    %c0 = arith.constant 0 : index
    %c0_0 = arith.constant 0 : index
    %0 = vector.load %arg1[%c0, %c0_0] : memref<16x32xf32, #tpu.memory_space<vmem>>, vector<16x32xf32>
    %c0_1 = arith.constant 0 : index
    %c0_2 = arith.constant 0 : index
    %1 = vector.load %arg2[%c0_1, %c0_2] : memref<16x16xf32, #tpu.memory_space<vmem>>, vector<16x16xf32>
    %c0_3 = arith.constant 0 : index
    %c0_4 = arith.constant 0 : index
    %c0_5 = arith.constant 0 : index
    %2 = vector.load %arg3[%c0_3, %c0_4, %c0_5] : memref<10x1x32xf32, #tpu.memory_space<vmem>>, vector<1x1x32xf32>
    %3 = vector.shape_cast %2 : vector<1x1x32xf32> to vector<1x32xf32>
    %c1 = arith.constant 1 : index
    %c0_6 = arith.constant 0 : index
    %c0_7 = arith.constant 0 : index
    %4 = vector.load %arg3[%c1, %c0_6, %c0_7] : memref<10x1x32xf32, #tpu.memory_space<vmem>>, vector<1x1x32xf32>
    %5 = vector.shape_cast %4 : vector<1x1x32xf32> to vector<1x32xf32>
    %cst = arith.constant dense<0.000000e+00> : vector<16xf32>
    %6 = vector.multi_reduction <add>, %0, %cst [1] : vector<16x32xf32> to vector<16xf32>
    %7 = vector.shape_cast %6 : vector<16xf32> to vector<16x1xf32>
    %cst_8 = arith.constant 3.200000e+01 : f32
    %8 = vector.broadcast %cst_8 : f32 to vector<16x1xf32>
    %9 = arith.divf %7, %8 : vector<16x1xf32>
    %10 = vector.broadcast %9 : vector<16x1xf32> to vector<16x32xf32>
    %11 = arith.subf %0, %10 : vector<16x32xf32>
    %12 = arith.mulf %11, %11 : vector<16x32xf32>
    %cst_9 = arith.constant dense<0.000000e+00> : vector<16xf32>
    %13 = vector.multi_reduction <add>, %12, %cst_9 [1] : vector<16x32xf32> to vector<16xf32>
    %14 = vector.shape_cast %13 : vector<16xf32> to vector<16x1xf32>
    %cst_10 = arith.constant 3.200000e+01 : f32
    %15 = vector.broadcast %cst_10 : f32 to vector<16x1xf32>
    %16 = arith.divf %14, %15 : vector<16x1xf32>
    %17 = vector.broadcast %9 : vector<16x1xf32> to vector<16x32xf32>
    %18 = arith.subf %0, %17 : vector<16x32xf32>
    %cst_11 = arith.constant 9.99999996E-13 : f32
    %19 = vector.broadcast %cst_11 : f32 to vector<16x1xf32>
    %20 = arith.addf %16, %19 : vector<16x1xf32>
    %21 = math.rsqrt %20 : vector<16x1xf32>
    %22 = vector.broadcast %21 : vector<16x1xf32> to vector<16x32xf32>
    %23 = arith.mulf %18, %22 : vector<16x32xf32>
    %24 = vector.broadcast %3 : vector<1x32xf32> to vector<16x32xf32>
    %25 = arith.mulf %23, %24 : vector<16x32xf32>
    %26 = vector.broadcast %5 : vector<1x32xf32> to vector<16x32xf32>
    %27 = arith.addf %25, %26 : vector<16x32xf32>
    %28 = arith.truncf %27 : vector<16x32xf32> to vector<16x32xbf16>
    %c0_12 = arith.constant 0 : index
    %c0_13 = arith.constant 0 : index
    %c0_14 = arith.constant 0 : index
    %29 = vector.load %arg7[%c0_12, %c0_13, %c0_14] : memref<2x1x32xf32, #tpu.memory_space<vmem>>, vector<1x1x32xf32>
    %30 = vector.shape_cast %29 : vector<1x1x32xf32> to vector<1x32xf32>
    %c0_15 = arith.constant 0 : index
    %c0_16 = arith.constant 0 : index
    %c0_17 = arith.constant 0 : index
    %31 = vector.load %arg4[%c0_15, %c0_16, %c0_17] : memref<12x32x16xbf16, #tpu.memory_space<vmem>>, vector<1x32x16xbf16>
    %32 = vector.shape_cast %31 : vector<1x32x16xbf16> to vector<32x16xbf16>
    %cst_18 = arith.constant dense<0.000000e+00> : vector<16x16xf32>
    %33 = tpu.matmul %28, %32, %cst_18 {dimension_numbers = #tpu.dot_dimension_numbers<[1], [0], [0], [1], [0, 0, 1, 1], [], []>} : vector<16x32xbf16>, vector<32x16xbf16>, vector<16x16xf32> -> vector<16x16xf32>
    %c0_19 = arith.constant 0 : index
    %c0_20 = arith.constant 0 : index
    %c0_21 = arith.constant 0 : index
    %34 = vector.load %arg5[%c0_19, %c0_20, %c0_21] : memref<12x1x16xf32, #tpu.memory_space<vmem>>, vector<1x1x16xf32>
    %35 = vector.shape_cast %34 : vector<1x1x16xf32> to vector<1x16xf32>
    %36 = vector.broadcast %35 : vector<1x16xf32> to vector<16x16xf32>
    %37 = arith.addf %33, %36 : vector<16x16xf32>
    %c2 = arith.constant 2 : index
    %c0_22 = arith.constant 0 : index
    %c0_23 = arith.constant 0 : index
    %38 = vector.load %arg4[%c2, %c0_22, %c0_23] : memref<12x32x16xbf16, #tpu.memory_space<vmem>>, vector<1x32x16xbf16>
    %39 = vector.shape_cast %38 : vector<1x32x16xbf16> to vector<32x16xbf16>
    %cst_24 = arith.constant dense<0.000000e+00> : vector<16x16xf32>
    %40 = tpu.matmul %28, %39, %cst_24 {dimension_numbers = #tpu.dot_dimension_numbers<[1], [0], [0], [1], [0, 0, 1, 1], [], []>} : vector<16x32xbf16>, vector<32x16xbf16>, vector<16x16xf32> -> vector<16x16xf32>
    %c2_25 = arith.constant 2 : index
    %c0_26 = arith.constant 0 : index
    %c0_27 = arith.constant 0 : index
    %41 = vector.load %arg5[%c2_25, %c0_26, %c0_27] : memref<12x1x16xf32, #tpu.memory_space<vmem>>, vector<1x1x16xf32>
    %42 = vector.shape_cast %41 : vector<1x1x16xf32> to vector<1x16xf32>
    %43 = vector.broadcast %42 : vector<1x16xf32> to vector<16x16xf32>
    %44 = arith.addf %40, %43 : vector<16x16xf32>
    %c4 = arith.constant 4 : index
    %c0_28 = arith.constant 0 : index
    %c0_29 = arith.constant 0 : index
    %45 = vector.load %arg4[%c4, %c0_28, %c0_29] : memref<12x32x16xbf16, #tpu.memory_space<vmem>>, vector<1x32x16xbf16>
    %46 = vector.shape_cast %45 : vector<1x32x16xbf16> to vector<32x16xbf16>
    %cst_30 = arith.constant dense<0.000000e+00> : vector<16x16xf32>
    %47 = tpu.matmul %28, %46, %cst_30 {dimension_numbers = #tpu.dot_dimension_numbers<[1], [0], [0], [1], [0, 0, 1, 1], [], []>} : vector<16x32xbf16>, vector<32x16xbf16>, vector<16x16xf32> -> vector<16x16xf32>
    %c4_31 = arith.constant 4 : index
    %c0_32 = arith.constant 0 : index
    %c0_33 = arith.constant 0 : index
    %48 = vector.load %arg5[%c4_31, %c0_32, %c0_33] : memref<12x1x16xf32, #tpu.memory_space<vmem>>, vector<1x1x16xf32>
    %49 = vector.shape_cast %48 : vector<1x1x16xf32> to vector<1x16xf32>
    %50 = vector.broadcast %49 : vector<1x16xf32> to vector<16x16xf32>
    %51 = arith.addf %47, %50 : vector<16x16xf32>
    %52 = arith.truncf %37 : vector<16x16xf32> to vector<16x16xbf16>
    %53 = arith.truncf %44 : vector<16x16xf32> to vector<16x16xbf16>
    %cst_34 = arith.constant dense<0.000000e+00> : vector<16x16xf32>
    %54 = tpu.matmul %52, %53, %cst_34 {dimension_numbers = #tpu.dot_dimension_numbers<[1], [1], [0], [0], [0, 0, 1, 0], [], []>} : vector<16x16xbf16>, vector<16x16xbf16>, vector<16x16xf32> -> vector<16x16xf32>
    %cst_35 = arith.constant 2.500000e-01 : f32
    %55 = vector.broadcast %cst_35 : f32 to vector<16x16xf32>
    %56 = arith.mulf %54, %55 : vector<16x16xf32>
    %57 = arith.addf %56, %1 : vector<16x16xf32>
    %cst_36 = arith.constant dense<0xFF800000> : vector<16xf32>
    %58 = vector.multi_reduction <maximumf>, %57, %cst_36 [1] : vector<16x16xf32> to vector<16xf32>
    %59 = vector.shape_cast %58 : vector<16xf32> to vector<16x1xf32>
    %60 = vector.broadcast %59 : vector<16x1xf32> to vector<16x16xf32>
    %61 = arith.subf %57, %60 : vector<16x16xf32>
    %62 = math.exp %61 : vector<16x16xf32>
    %cst_37 = arith.constant dense<0.000000e+00> : vector<16xf32>
    %63 = vector.multi_reduction <add>, %62, %cst_37 [1] : vector<16x16xf32> to vector<16xf32>
    %64 = vector.shape_cast %63 : vector<16xf32> to vector<16x1xf32>
    %65 = tpu.reciprocal %64 {approx = true} : vector<16x1xf32> -> vector<16x1xf32>
    %66 = vector.broadcast %65 : vector<16x1xf32> to vector<16x16xf32>
    %67 = arith.mulf %62, %66 : vector<16x16xf32>
    %68 = arith.truncf %67 : vector<16x16xf32> to vector<16x16xbf16>
    %69 = arith.truncf %51 : vector<16x16xf32> to vector<16x16xbf16>
    %cst_38 = arith.constant dense<0.000000e+00> : vector<16x16xf32>
    %70 = tpu.matmul %68, %69, %cst_38 {dimension_numbers = #tpu.dot_dimension_numbers<[1], [0], [0], [1], [0, 0, 1, 1], [], []>} : vector<16x16xbf16>, vector<16x16xbf16>, vector<16x16xf32> -> vector<16x16xf32>
    %c0_39 = arith.constant 0 : index
    %c0_40 = arith.constant 0 : index
    %c0_41 = arith.constant 0 : index
    %71 = vector.load %arg6[%c0_39, %c0_40, %c0_41] : memref<4x16x32xbf16, #tpu.memory_space<vmem>>, vector<1x16x32xbf16>
    %72 = vector.shape_cast %71 : vector<1x16x32xbf16> to vector<16x32xbf16>
    %73 = arith.truncf %70 : vector<16x16xf32> to vector<16x16xbf16>
    %cst_42 = arith.constant dense<0.000000e+00> : vector<16x32xf32>
    %74 = tpu.matmul %73, %72, %cst_42 {dimension_numbers = #tpu.dot_dimension_numbers<[1], [0], [0], [1], [0, 0, 1, 1], [], []>} : vector<16x16xbf16>, vector<16x32xbf16>, vector<16x32xf32> -> vector<16x32xf32>
    %75 = vector.broadcast %30 : vector<1x32xf32> to vector<16x32xf32>
    %76 = arith.addf %75, %74 : vector<16x32xf32>
    %c1_43 = arith.constant 1 : index
    %c0_44 = arith.constant 0 : index
    %c0_45 = arith.constant 0 : index
    %77 = vector.load %arg4[%c1_43, %c0_44, %c0_45] : memref<12x32x16xbf16, #tpu.memory_space<vmem>>, vector<1x32x16xbf16>
    %78 = vector.shape_cast %77 : vector<1x32x16xbf16> to vector<32x16xbf16>
    %cst_46 = arith.constant dense<0.000000e+00> : vector<16x16xf32>
    %79 = tpu.matmul %28, %78, %cst_46 {dimension_numbers = #tpu.dot_dimension_numbers<[1], [0], [0], [1], [0, 0, 1, 1], [], []>} : vector<16x32xbf16>, vector<32x16xbf16>, vector<16x16xf32> -> vector<16x16xf32>
    %c1_47 = arith.constant 1 : index
    %c0_48 = arith.constant 0 : index
    %c0_49 = arith.constant 0 : index
    %80 = vector.load %arg5[%c1_47, %c0_48, %c0_49] : memref<12x1x16xf32, #tpu.memory_space<vmem>>, vector<1x1x16xf32>
    %81 = vector.shape_cast %80 : vector<1x1x16xf32> to vector<1x16xf32>
    %82 = vector.broadcast %81 : vector<1x16xf32> to vector<16x16xf32>
    %83 = arith.addf %79, %82 : vector<16x16xf32>
    %c3 = arith.constant 3 : index
    %c0_50 = arith.constant 0 : index
    %c0_51 = arith.constant 0 : index
    %84 = vector.load %arg4[%c3, %c0_50, %c0_51] : memref<12x32x16xbf16, #tpu.memory_space<vmem>>, vector<1x32x16xbf16>
    %85 = vector.shape_cast %84 : vector<1x32x16xbf16> to vector<32x16xbf16>
    %cst_52 = arith.constant dense<0.000000e+00> : vector<16x16xf32>
    %86 = tpu.matmul %28, %85, %cst_52 {dimension_numbers = #tpu.dot_dimension_numbers<[1], [0], [0], [1], [0, 0, 1, 1], [], []>} : vector<16x32xbf16>, vector<32x16xbf16>, vector<16x16xf32> -> vector<16x16xf32>
    %c3_53 = arith.constant 3 : index
    %c0_54 = arith.constant 0 : index
    %c0_55 = arith.constant 0 : index
    %87 = vector.load %arg5[%c3_53, %c0_54, %c0_55] : memref<12x1x16xf32, #tpu.memory_space<vmem>>, vector<1x1x16xf32>
    %88 = vector.shape_cast %87 : vector<1x1x16xf32> to vector<1x16xf32>
    %89 = vector.broadcast %88 : vector<1x16xf32> to vector<16x16xf32>
    %90 = arith.addf %86, %89 : vector<16x16xf32>
    %c5 = arith.constant 5 : index
    %c0_56 = arith.constant 0 : index
    %c0_57 = arith.constant 0 : index
    %91 = vector.load %arg4[%c5, %c0_56, %c0_57] : memref<12x32x16xbf16, #tpu.memory_space<vmem>>, vector<1x32x16xbf16>
    %92 = vector.shape_cast %91 : vector<1x32x16xbf16> to vector<32x16xbf16>
    %cst_58 = arith.constant dense<0.000000e+00> : vector<16x16xf32>
    %93 = tpu.matmul %28, %92, %cst_58 {dimension_numbers = #tpu.dot_dimension_numbers<[1], [0], [0], [1], [0, 0, 1, 1], [], []>} : vector<16x32xbf16>, vector<32x16xbf16>, vector<16x16xf32> -> vector<16x16xf32>
    %c5_59 = arith.constant 5 : index
    %c0_60 = arith.constant 0 : index
    %c0_61 = arith.constant 0 : index
    %94 = vector.load %arg5[%c5_59, %c0_60, %c0_61] : memref<12x1x16xf32, #tpu.memory_space<vmem>>, vector<1x1x16xf32>
    %95 = vector.shape_cast %94 : vector<1x1x16xf32> to vector<1x16xf32>
    %96 = vector.broadcast %95 : vector<1x16xf32> to vector<16x16xf32>
    %97 = arith.addf %93, %96 : vector<16x16xf32>
    %98 = arith.truncf %83 : vector<16x16xf32> to vector<16x16xbf16>
    %99 = arith.truncf %90 : vector<16x16xf32> to vector<16x16xbf16>
    %cst_62 = arith.constant dense<0.000000e+00> : vector<16x16xf32>
    %100 = tpu.matmul %98, %99, %cst_62 {dimension_numbers = #tpu.dot_dimension_numbers<[1], [1], [0], [0], [0, 0, 1, 0], [], []>} : vector<16x16xbf16>, vector<16x16xbf16>, vector<16x16xf32> -> vector<16x16xf32>
    %cst_63 = arith.constant 2.500000e-01 : f32
    %101 = vector.broadcast %cst_63 : f32 to vector<16x16xf32>
    %102 = arith.mulf %100, %101 : vector<16x16xf32>
    %103 = arith.addf %102, %1 : vector<16x16xf32>
    %cst_64 = arith.constant dense<0xFF800000> : vector<16xf32>
    %104 = vector.multi_reduction <maximumf>, %103, %cst_64 [1] : vector<16x16xf32> to vector<16xf32>
    %105 = vector.shape_cast %104 : vector<16xf32> to vector<16x1xf32>
    %106 = vector.broadcast %105 : vector<16x1xf32> to vector<16x16xf32>
    %107 = arith.subf %103, %106 : vector<16x16xf32>
    %108 = math.exp %107 : vector<16x16xf32>
    %cst_65 = arith.constant dense<0.000000e+00> : vector<16xf32>
    %109 = vector.multi_reduction <add>, %108, %cst_65 [1] : vector<16x16xf32> to vector<16xf32>
    %110 = vector.shape_cast %109 : vector<16xf32> to vector<16x1xf32>
    %111 = tpu.reciprocal %110 {approx = true} : vector<16x1xf32> -> vector<16x1xf32>
    %112 = vector.broadcast %111 : vector<16x1xf32> to vector<16x16xf32>
    %113 = arith.mulf %108, %112 : vector<16x16xf32>
    %114 = arith.truncf %113 : vector<16x16xf32> to vector<16x16xbf16>
    %115 = arith.truncf %97 : vector<16x16xf32> to vector<16x16xbf16>
    %cst_66 = arith.constant dense<0.000000e+00> : vector<16x16xf32>
    %116 = tpu.matmul %114, %115, %cst_66 {dimension_numbers = #tpu.dot_dimension_numbers<[1], [0], [0], [1], [0, 0, 1, 1], [], []>} : vector<16x16xbf16>, vector<16x16xbf16>, vector<16x16xf32> -> vector<16x16xf32>
    %c1_67 = arith.constant 1 : index
    %c0_68 = arith.constant 0 : index
    %c0_69 = arith.constant 0 : index
    %117 = vector.load %arg6[%c1_67, %c0_68, %c0_69] : memref<4x16x32xbf16, #tpu.memory_space<vmem>>, vector<1x16x32xbf16>
    %118 = vector.shape_cast %117 : vector<1x16x32xbf16> to vector<16x32xbf16>
    %119 = arith.truncf %116 : vector<16x16xf32> to vector<16x16xbf16>
    %cst_70 = arith.constant dense<0.000000e+00> : vector<16x32xf32>
    %120 = tpu.matmul %119, %118, %cst_70 {dimension_numbers = #tpu.dot_dimension_numbers<[1], [0], [0], [1], [0, 0, 1, 1], [], []>} : vector<16x16xbf16>, vector<16x32xbf16>, vector<16x32xf32> -> vector<16x32xf32>
    %121 = arith.addf %76, %120 : vector<16x32xf32>
    %122 = arith.addf %27, %121 : vector<16x32xf32>
    %c2_71 = arith.constant 2 : index
    %c0_72 = arith.constant 0 : index
    %c0_73 = arith.constant 0 : index
    %123 = vector.load %arg3[%c2_71, %c0_72, %c0_73] : memref<10x1x32xf32, #tpu.memory_space<vmem>>, vector<1x1x32xf32>
    %124 = vector.shape_cast %123 : vector<1x1x32xf32> to vector<1x32xf32>
    %c3_74 = arith.constant 3 : index
    %c0_75 = arith.constant 0 : index
    %c0_76 = arith.constant 0 : index
    %125 = vector.load %arg3[%c3_74, %c0_75, %c0_76] : memref<10x1x32xf32, #tpu.memory_space<vmem>>, vector<1x1x32xf32>
    %126 = vector.shape_cast %125 : vector<1x1x32xf32> to vector<1x32xf32>
    %cst_77 = arith.constant dense<0.000000e+00> : vector<16xf32>
    %127 = vector.multi_reduction <add>, %122, %cst_77 [1] : vector<16x32xf32> to vector<16xf32>
    %128 = vector.shape_cast %127 : vector<16xf32> to vector<16x1xf32>
    %cst_78 = arith.constant 3.200000e+01 : f32
    %129 = vector.broadcast %cst_78 : f32 to vector<16x1xf32>
    %130 = arith.divf %128, %129 : vector<16x1xf32>
    %131 = vector.broadcast %130 : vector<16x1xf32> to vector<16x32xf32>
    %132 = arith.subf %122, %131 : vector<16x32xf32>
    %133 = arith.mulf %132, %132 : vector<16x32xf32>
    %cst_79 = arith.constant dense<0.000000e+00> : vector<16xf32>
    %134 = vector.multi_reduction <add>, %133, %cst_79 [1] : vector<16x32xf32> to vector<16xf32>
    %135 = vector.shape_cast %134 : vector<16xf32> to vector<16x1xf32>
    %cst_80 = arith.constant 3.200000e+01 : f32
    %136 = vector.broadcast %cst_80 : f32 to vector<16x1xf32>
    %137 = arith.divf %135, %136 : vector<16x1xf32>
    %138 = vector.broadcast %130 : vector<16x1xf32> to vector<16x32xf32>
    %139 = arith.subf %122, %138 : vector<16x32xf32>
    %cst_81 = arith.constant 9.99999996E-13 : f32
    %140 = vector.broadcast %cst_81 : f32 to vector<16x1xf32>
    %141 = arith.addf %137, %140 : vector<16x1xf32>
    %142 = math.rsqrt %141 : vector<16x1xf32>
    %143 = vector.broadcast %142 : vector<16x1xf32> to vector<16x32xf32>
    %144 = arith.mulf %139, %143 : vector<16x32xf32>
    %145 = vector.broadcast %124 : vector<1x32xf32> to vector<16x32xf32>
    %146 = arith.mulf %144, %145 : vector<16x32xf32>
    %147 = vector.broadcast %126 : vector<1x32xf32> to vector<16x32xf32>
    %148 = arith.addf %146, %147 : vector<16x32xf32>
    %c0_82 = arith.constant 0 : index
    %c0_83 = arith.constant 0 : index
    %c0_84 = arith.constant 0 : index
    %149 = vector.load %arg8[%c0_82, %c0_83, %c0_84] : memref<2x32x128xbf16, #tpu.memory_space<vmem>>, vector<1x32x128xbf16>
    %150 = vector.shape_cast %149 : vector<1x32x128xbf16> to vector<32x128xbf16>
    %151 = arith.truncf %148 : vector<16x32xf32> to vector<16x32xbf16>
    %cst_85 = arith.constant dense<0.000000e+00> : vector<16x128xf32>
    %152 = tpu.matmul %151, %150, %cst_85 {dimension_numbers = #tpu.dot_dimension_numbers<[1], [0], [0], [1], [0, 0, 1, 1], [], []>} : vector<16x32xbf16>, vector<32x128xbf16>, vector<16x128xf32> -> vector<16x128xf32>
    %c0_86 = arith.constant 0 : index
    %c0_87 = arith.constant 0 : index
    %c0_88 = arith.constant 0 : index
    %153 = vector.load %arg9[%c0_86, %c0_87, %c0_88] : memref<2x1x128xf32, #tpu.memory_space<vmem>>, vector<1x1x128xf32>
    %154 = vector.shape_cast %153 : vector<1x1x128xf32> to vector<1x128xf32>
    %155 = vector.broadcast %154 : vector<1x128xf32> to vector<16x128xf32>
    %156 = arith.addf %152, %155 : vector<16x128xf32>
    %157 = arith.mulf %156, %156 : vector<16x128xf32>
    %158 = arith.mulf %156, %157 : vector<16x128xf32>
    %cst_89 = arith.constant 4.471500e-02 : f32
    %159 = vector.broadcast %cst_89 : f32 to vector<16x128xf32>
    %160 = arith.mulf %159, %158 : vector<16x128xf32>
    %161 = arith.addf %156, %160 : vector<16x128xf32>
    %cst_90 = arith.constant 0.797884583 : f32
    %162 = vector.broadcast %cst_90 : f32 to vector<16x128xf32>
    %163 = arith.mulf %162, %161 : vector<16x128xf32>
    %164 = math.tanh %163 : vector<16x128xf32>
    %cst_91 = arith.constant 1.000000e+00 : f32
    %165 = vector.broadcast %cst_91 : f32 to vector<16x128xf32>
    %166 = arith.addf %165, %164 : vector<16x128xf32>
    %cst_92 = arith.constant 5.000000e-01 : f32
    %167 = vector.broadcast %cst_92 : f32 to vector<16x128xf32>
    %168 = arith.mulf %167, %166 : vector<16x128xf32>
    %169 = arith.mulf %156, %168 : vector<16x128xf32>
    %c0_93 = arith.constant 0 : index
    %c0_94 = arith.constant 0 : index
    %c0_95 = arith.constant 0 : index
    %170 = vector.load %arg10[%c0_93, %c0_94, %c0_95] : memref<2x128x32xbf16, #tpu.memory_space<vmem>>, vector<1x128x32xbf16>
    %171 = vector.shape_cast %170 : vector<1x128x32xbf16> to vector<128x32xbf16>
    %172 = arith.truncf %169 : vector<16x128xf32> to vector<16x128xbf16>
    %cst_96 = arith.constant dense<0.000000e+00> : vector<16x32xf32>
    %173 = tpu.matmul %172, %171, %cst_96 {dimension_numbers = #tpu.dot_dimension_numbers<[1], [0], [0], [1], [0, 0, 1, 1], [], []>} : vector<16x128xbf16>, vector<128x32xbf16>, vector<16x32xf32> -> vector<16x32xf32>
    %c0_97 = arith.constant 0 : index
    %c0_98 = arith.constant 0 : index
    %c0_99 = arith.constant 0 : index
    %174 = vector.load %arg11[%c0_97, %c0_98, %c0_99] : memref<2x1x32xf32, #tpu.memory_space<vmem>>, vector<1x1x32xf32>
    %175 = vector.shape_cast %174 : vector<1x1x32xf32> to vector<1x32xf32>
    %176 = vector.broadcast %175 : vector<1x32xf32> to vector<16x32xf32>
    %177 = arith.addf %173, %176 : vector<16x32xf32>
    %178 = arith.addf %148, %177 : vector<16x32xf32>
    %c4_100 = arith.constant 4 : index
    %c0_101 = arith.constant 0 : index
    %c0_102 = arith.constant 0 : index
    %179 = vector.load %arg3[%c4_100, %c0_101, %c0_102] : memref<10x1x32xf32, #tpu.memory_space<vmem>>, vector<1x1x32xf32>
    %180 = vector.shape_cast %179 : vector<1x1x32xf32> to vector<1x32xf32>
    %c5_103 = arith.constant 5 : index
    %c0_104 = arith.constant 0 : index
    %c0_105 = arith.constant 0 : index
    %181 = vector.load %arg3[%c5_103, %c0_104, %c0_105] : memref<10x1x32xf32, #tpu.memory_space<vmem>>, vector<1x1x32xf32>
    %182 = vector.shape_cast %181 : vector<1x1x32xf32> to vector<1x32xf32>
    %cst_106 = arith.constant dense<0.000000e+00> : vector<16xf32>
    %183 = vector.multi_reduction <add>, %178, %cst_106 [1] : vector<16x32xf32> to vector<16xf32>
    %184 = vector.shape_cast %183 : vector<16xf32> to vector<16x1xf32>
    %cst_107 = arith.constant 3.200000e+01 : f32
    %185 = vector.broadcast %cst_107 : f32 to vector<16x1xf32>
    %186 = arith.divf %184, %185 : vector<16x1xf32>
    %187 = vector.broadcast %186 : vector<16x1xf32> to vector<16x32xf32>
    %188 = arith.subf %178, %187 : vector<16x32xf32>
    %189 = arith.mulf %188, %188 : vector<16x32xf32>
    %cst_108 = arith.constant dense<0.000000e+00> : vector<16xf32>
    %190 = vector.multi_reduction <add>, %189, %cst_108 [1] : vector<16x32xf32> to vector<16xf32>
    %191 = vector.shape_cast %190 : vector<16xf32> to vector<16x1xf32>
    %cst_109 = arith.constant 3.200000e+01 : f32
    %192 = vector.broadcast %cst_109 : f32 to vector<16x1xf32>
    %193 = arith.divf %191, %192 : vector<16x1xf32>
    %194 = vector.broadcast %186 : vector<16x1xf32> to vector<16x32xf32>
    %195 = arith.subf %178, %194 : vector<16x32xf32>
    %cst_110 = arith.constant 9.99999996E-13 : f32
    %196 = vector.broadcast %cst_110 : f32 to vector<16x1xf32>
    %197 = arith.addf %193, %196 : vector<16x1xf32>
    %198 = math.rsqrt %197 : vector<16x1xf32>
    %199 = vector.broadcast %198 : vector<16x1xf32> to vector<16x32xf32>
    %200 = arith.mulf %195, %199 : vector<16x32xf32>
    %201 = vector.broadcast %180 : vector<1x32xf32> to vector<16x32xf32>
    %202 = arith.mulf %200, %201 : vector<16x32xf32>
    %203 = vector.broadcast %182 : vector<1x32xf32> to vector<16x32xf32>
    %204 = arith.addf %202, %203 : vector<16x32xf32>
    %205 = arith.truncf %204 : vector<16x32xf32> to vector<16x32xbf16>
    %c1_111 = arith.constant 1 : index
    %c0_112 = arith.constant 0 : index
    %c0_113 = arith.constant 0 : index
    %206 = vector.load %arg7[%c1_111, %c0_112, %c0_113] : memref<2x1x32xf32, #tpu.memory_space<vmem>>, vector<1x1x32xf32>
    %207 = vector.shape_cast %206 : vector<1x1x32xf32> to vector<1x32xf32>
    %c6 = arith.constant 6 : index
    %c0_114 = arith.constant 0 : index
    %c0_115 = arith.constant 0 : index
    %208 = vector.load %arg4[%c6, %c0_114, %c0_115] : memref<12x32x16xbf16, #tpu.memory_space<vmem>>, vector<1x32x16xbf16>
    %209 = vector.shape_cast %208 : vector<1x32x16xbf16> to vector<32x16xbf16>
    %cst_116 = arith.constant dense<0.000000e+00> : vector<16x16xf32>
    %210 = tpu.matmul %205, %209, %cst_116 {dimension_numbers = #tpu.dot_dimension_numbers<[1], [0], [0], [1], [0, 0, 1, 1], [], []>} : vector<16x32xbf16>, vector<32x16xbf16>, vector<16x16xf32> -> vector<16x16xf32>
    %c6_117 = arith.constant 6 : index
    %c0_118 = arith.constant 0 : index
    %c0_119 = arith.constant 0 : index
    %211 = vector.load %arg5[%c6_117, %c0_118, %c0_119] : memref<12x1x16xf32, #tpu.memory_space<vmem>>, vector<1x1x16xf32>
    %212 = vector.shape_cast %211 : vector<1x1x16xf32> to vector<1x16xf32>
    %213 = vector.broadcast %212 : vector<1x16xf32> to vector<16x16xf32>
    %214 = arith.addf %210, %213 : vector<16x16xf32>
    %c8 = arith.constant 8 : index
    %c0_120 = arith.constant 0 : index
    %c0_121 = arith.constant 0 : index
    %215 = vector.load %arg4[%c8, %c0_120, %c0_121] : memref<12x32x16xbf16, #tpu.memory_space<vmem>>, vector<1x32x16xbf16>
    %216 = vector.shape_cast %215 : vector<1x32x16xbf16> to vector<32x16xbf16>
    %cst_122 = arith.constant dense<0.000000e+00> : vector<16x16xf32>
    %217 = tpu.matmul %205, %216, %cst_122 {dimension_numbers = #tpu.dot_dimension_numbers<[1], [0], [0], [1], [0, 0, 1, 1], [], []>} : vector<16x32xbf16>, vector<32x16xbf16>, vector<16x16xf32> -> vector<16x16xf32>
    %c8_123 = arith.constant 8 : index
    %c0_124 = arith.constant 0 : index
    %c0_125 = arith.constant 0 : index
    %218 = vector.load %arg5[%c8_123, %c0_124, %c0_125] : memref<12x1x16xf32, #tpu.memory_space<vmem>>, vector<1x1x16xf32>
    %219 = vector.shape_cast %218 : vector<1x1x16xf32> to vector<1x16xf32>
    %220 = vector.broadcast %219 : vector<1x16xf32> to vector<16x16xf32>
    %221 = arith.addf %217, %220 : vector<16x16xf32>
    %c10 = arith.constant 10 : index
    %c0_126 = arith.constant 0 : index
    %c0_127 = arith.constant 0 : index
    %222 = vector.load %arg4[%c10, %c0_126, %c0_127] : memref<12x32x16xbf16, #tpu.memory_space<vmem>>, vector<1x32x16xbf16>
    %223 = vector.shape_cast %222 : vector<1x32x16xbf16> to vector<32x16xbf16>
    %cst_128 = arith.constant dense<0.000000e+00> : vector<16x16xf32>
    %224 = tpu.matmul %205, %223, %cst_128 {dimension_numbers = #tpu.dot_dimension_numbers<[1], [0], [0], [1], [0, 0, 1, 1], [], []>} : vector<16x32xbf16>, vector<32x16xbf16>, vector<16x16xf32> -> vector<16x16xf32>
    %c10_129 = arith.constant 10 : index
    %c0_130 = arith.constant 0 : index
    %c0_131 = arith.constant 0 : index
    %225 = vector.load %arg5[%c10_129, %c0_130, %c0_131] : memref<12x1x16xf32, #tpu.memory_space<vmem>>, vector<1x1x16xf32>
    %226 = vector.shape_cast %225 : vector<1x1x16xf32> to vector<1x16xf32>
    %227 = vector.broadcast %226 : vector<1x16xf32> to vector<16x16xf32>
    %228 = arith.addf %224, %227 : vector<16x16xf32>
    %229 = arith.truncf %214 : vector<16x16xf32> to vector<16x16xbf16>
    %230 = arith.truncf %221 : vector<16x16xf32> to vector<16x16xbf16>
    %cst_132 = arith.constant dense<0.000000e+00> : vector<16x16xf32>
    %231 = tpu.matmul %229, %230, %cst_132 {dimension_numbers = #tpu.dot_dimension_numbers<[1], [1], [0], [0], [0, 0, 1, 0], [], []>} : vector<16x16xbf16>, vector<16x16xbf16>, vector<16x16xf32> -> vector<16x16xf32>
    %cst_133 = arith.constant 2.500000e-01 : f32
    %232 = vector.broadcast %cst_133 : f32 to vector<16x16xf32>
    %233 = arith.mulf %231, %232 : vector<16x16xf32>
    %234 = arith.addf %233, %1 : vector<16x16xf32>
    %cst_134 = arith.constant dense<0xFF800000> : vector<16xf32>
    %235 = vector.multi_reduction <maximumf>, %234, %cst_134 [1] : vector<16x16xf32> to vector<16xf32>
    %236 = vector.shape_cast %235 : vector<16xf32> to vector<16x1xf32>
    %237 = vector.broadcast %236 : vector<16x1xf32> to vector<16x16xf32>
    %238 = arith.subf %234, %237 : vector<16x16xf32>
    %239 = math.exp %238 : vector<16x16xf32>
    %cst_135 = arith.constant dense<0.000000e+00> : vector<16xf32>
    %240 = vector.multi_reduction <add>, %239, %cst_135 [1] : vector<16x16xf32> to vector<16xf32>
    %241 = vector.shape_cast %240 : vector<16xf32> to vector<16x1xf32>
    %242 = tpu.reciprocal %241 {approx = true} : vector<16x1xf32> -> vector<16x1xf32>
    %243 = vector.broadcast %242 : vector<16x1xf32> to vector<16x16xf32>
    %244 = arith.mulf %239, %243 : vector<16x16xf32>
    %245 = arith.truncf %244 : vector<16x16xf32> to vector<16x16xbf16>
    %246 = arith.truncf %228 : vector<16x16xf32> to vector<16x16xbf16>
    %cst_136 = arith.constant dense<0.000000e+00> : vector<16x16xf32>
    %247 = tpu.matmul %245, %246, %cst_136 {dimension_numbers = #tpu.dot_dimension_numbers<[1], [0], [0], [1], [0, 0, 1, 1], [], []>} : vector<16x16xbf16>, vector<16x16xbf16>, vector<16x16xf32> -> vector<16x16xf32>
    %c2_137 = arith.constant 2 : index
    %c0_138 = arith.constant 0 : index
    %c0_139 = arith.constant 0 : index
    %248 = vector.load %arg6[%c2_137, %c0_138, %c0_139] : memref<4x16x32xbf16, #tpu.memory_space<vmem>>, vector<1x16x32xbf16>
    %249 = vector.shape_cast %248 : vector<1x16x32xbf16> to vector<16x32xbf16>
    %250 = arith.truncf %247 : vector<16x16xf32> to vector<16x16xbf16>
    %cst_140 = arith.constant dense<0.000000e+00> : vector<16x32xf32>
    %251 = tpu.matmul %250, %249, %cst_140 {dimension_numbers = #tpu.dot_dimension_numbers<[1], [0], [0], [1], [0, 0, 1, 1], [], []>} : vector<16x16xbf16>, vector<16x32xbf16>, vector<16x32xf32> -> vector<16x32xf32>
    %252 = vector.broadcast %207 : vector<1x32xf32> to vector<16x32xf32>
    %253 = arith.addf %252, %251 : vector<16x32xf32>
    %c7 = arith.constant 7 : index
    %c0_141 = arith.constant 0 : index
    %c0_142 = arith.constant 0 : index
    %254 = vector.load %arg4[%c7, %c0_141, %c0_142] : memref<12x32x16xbf16, #tpu.memory_space<vmem>>, vector<1x32x16xbf16>
    %255 = vector.shape_cast %254 : vector<1x32x16xbf16> to vector<32x16xbf16>
    %cst_143 = arith.constant dense<0.000000e+00> : vector<16x16xf32>
    %256 = tpu.matmul %205, %255, %cst_143 {dimension_numbers = #tpu.dot_dimension_numbers<[1], [0], [0], [1], [0, 0, 1, 1], [], []>} : vector<16x32xbf16>, vector<32x16xbf16>, vector<16x16xf32> -> vector<16x16xf32>
    %c7_144 = arith.constant 7 : index
    %c0_145 = arith.constant 0 : index
    %c0_146 = arith.constant 0 : index
    %257 = vector.load %arg5[%c7_144, %c0_145, %c0_146] : memref<12x1x16xf32, #tpu.memory_space<vmem>>, vector<1x1x16xf32>
    %258 = vector.shape_cast %257 : vector<1x1x16xf32> to vector<1x16xf32>
    %259 = vector.broadcast %258 : vector<1x16xf32> to vector<16x16xf32>
    %260 = arith.addf %256, %259 : vector<16x16xf32>
    %c9 = arith.constant 9 : index
    %c0_147 = arith.constant 0 : index
    %c0_148 = arith.constant 0 : index
    %261 = vector.load %arg4[%c9, %c0_147, %c0_148] : memref<12x32x16xbf16, #tpu.memory_space<vmem>>, vector<1x32x16xbf16>
    %262 = vector.shape_cast %261 : vector<1x32x16xbf16> to vector<32x16xbf16>
    %cst_149 = arith.constant dense<0.000000e+00> : vector<16x16xf32>
    %263 = tpu.matmul %205, %262, %cst_149 {dimension_numbers = #tpu.dot_dimension_numbers<[1], [0], [0], [1], [0, 0, 1, 1], [], []>} : vector<16x32xbf16>, vector<32x16xbf16>, vector<16x16xf32> -> vector<16x16xf32>
    %c9_150 = arith.constant 9 : index
    %c0_151 = arith.constant 0 : index
    %c0_152 = arith.constant 0 : index
    %264 = vector.load %arg5[%c9_150, %c0_151, %c0_152] : memref<12x1x16xf32, #tpu.memory_space<vmem>>, vector<1x1x16xf32>
    %265 = vector.shape_cast %264 : vector<1x1x16xf32> to vector<1x16xf32>
    %266 = vector.broadcast %265 : vector<1x16xf32> to vector<16x16xf32>
    %267 = arith.addf %263, %266 : vector<16x16xf32>
    %c11 = arith.constant 11 : index
    %c0_153 = arith.constant 0 : index
    %c0_154 = arith.constant 0 : index
    %268 = vector.load %arg4[%c11, %c0_153, %c0_154] : memref<12x32x16xbf16, #tpu.memory_space<vmem>>, vector<1x32x16xbf16>
    %269 = vector.shape_cast %268 : vector<1x32x16xbf16> to vector<32x16xbf16>
    %cst_155 = arith.constant dense<0.000000e+00> : vector<16x16xf32>
    %270 = tpu.matmul %205, %269, %cst_155 {dimension_numbers = #tpu.dot_dimension_numbers<[1], [0], [0], [1], [0, 0, 1, 1], [], []>} : vector<16x32xbf16>, vector<32x16xbf16>, vector<16x16xf32> -> vector<16x16xf32>
    %c11_156 = arith.constant 11 : index
    %c0_157 = arith.constant 0 : index
    %c0_158 = arith.constant 0 : index
    %271 = vector.load %arg5[%c11_156, %c0_157, %c0_158] : memref<12x1x16xf32, #tpu.memory_space<vmem>>, vector<1x1x16xf32>
    %272 = vector.shape_cast %271 : vector<1x1x16xf32> to vector<1x16xf32>
    %273 = vector.broadcast %272 : vector<1x16xf32> to vector<16x16xf32>
    %274 = arith.addf %270, %273 : vector<16x16xf32>
    %275 = arith.truncf %260 : vector<16x16xf32> to vector<16x16xbf16>
    %276 = arith.truncf %267 : vector<16x16xf32> to vector<16x16xbf16>
    %cst_159 = arith.constant dense<0.000000e+00> : vector<16x16xf32>
    %277 = tpu.matmul %275, %276, %cst_159 {dimension_numbers = #tpu.dot_dimension_numbers<[1], [1], [0], [0], [0, 0, 1, 0], [], []>} : vector<16x16xbf16>, vector<16x16xbf16>, vector<16x16xf32> -> vector<16x16xf32>
    %cst_160 = arith.constant 2.500000e-01 : f32
    %278 = vector.broadcast %cst_160 : f32 to vector<16x16xf32>
    %279 = arith.mulf %277, %278 : vector<16x16xf32>
    %280 = arith.addf %279, %1 : vector<16x16xf32>
    %cst_161 = arith.constant dense<0xFF800000> : vector<16xf32>
    %281 = vector.multi_reduction <maximumf>, %280, %cst_161 [1] : vector<16x16xf32> to vector<16xf32>
    %282 = vector.shape_cast %281 : vector<16xf32> to vector<16x1xf32>
    %283 = vector.broadcast %282 : vector<16x1xf32> to vector<16x16xf32>
    %284 = arith.subf %280, %283 : vector<16x16xf32>
    %285 = math.exp %284 : vector<16x16xf32>
    %cst_162 = arith.constant dense<0.000000e+00> : vector<16xf32>
    %286 = vector.multi_reduction <add>, %285, %cst_162 [1] : vector<16x16xf32> to vector<16xf32>
    %287 = vector.shape_cast %286 : vector<16xf32> to vector<16x1xf32>
    %288 = tpu.reciprocal %287 {approx = true} : vector<16x1xf32> -> vector<16x1xf32>
    %289 = vector.broadcast %288 : vector<16x1xf32> to vector<16x16xf32>
    %290 = arith.mulf %285, %289 : vector<16x16xf32>
    %291 = arith.truncf %290 : vector<16x16xf32> to vector<16x16xbf16>
    %292 = arith.truncf %274 : vector<16x16xf32> to vector<16x16xbf16>
    %cst_163 = arith.constant dense<0.000000e+00> : vector<16x16xf32>
    %293 = tpu.matmul %291, %292, %cst_163 {dimension_numbers = #tpu.dot_dimension_numbers<[1], [0], [0], [1], [0, 0, 1, 1], [], []>} : vector<16x16xbf16>, vector<16x16xbf16>, vector<16x16xf32> -> vector<16x16xf32>
    %c3_164 = arith.constant 3 : index
    %c0_165 = arith.constant 0 : index
    %c0_166 = arith.constant 0 : index
    %294 = vector.load %arg6[%c3_164, %c0_165, %c0_166] : memref<4x16x32xbf16, #tpu.memory_space<vmem>>, vector<1x16x32xbf16>
    %295 = vector.shape_cast %294 : vector<1x16x32xbf16> to vector<16x32xbf16>
    %296 = arith.truncf %293 : vector<16x16xf32> to vector<16x16xbf16>
    %cst_167 = arith.constant dense<0.000000e+00> : vector<16x32xf32>
    %297 = tpu.matmul %296, %295, %cst_167 {dimension_numbers = #tpu.dot_dimension_numbers<[1], [0], [0], [1], [0, 0, 1, 1], [], []>} : vector<16x16xbf16>, vector<16x32xbf16>, vector<16x32xf32> -> vector<16x32xf32>
    %298 = arith.addf %253, %297 : vector<16x32xf32>
    %299 = arith.addf %204, %298 : vector<16x32xf32>
    %c6_168 = arith.constant 6 : index
    %c0_169 = arith.constant 0 : index
    %c0_170 = arith.constant 0 : index
    %300 = vector.load %arg3[%c6_168, %c0_169, %c0_170] : memref<10x1x32xf32, #tpu.memory_space<vmem>>, vector<1x1x32xf32>
    %301 = vector.shape_cast %300 : vector<1x1x32xf32> to vector<1x32xf32>
    %c7_171 = arith.constant 7 : index
    %c0_172 = arith.constant 0 : index
    %c0_173 = arith.constant 0 : index
    %302 = vector.load %arg3[%c7_171, %c0_172, %c0_173] : memref<10x1x32xf32, #tpu.memory_space<vmem>>, vector<1x1x32xf32>
    %303 = vector.shape_cast %302 : vector<1x1x32xf32> to vector<1x32xf32>
    %cst_174 = arith.constant dense<0.000000e+00> : vector<16xf32>
    %304 = vector.multi_reduction <add>, %299, %cst_174 [1] : vector<16x32xf32> to vector<16xf32>
    %305 = vector.shape_cast %304 : vector<16xf32> to vector<16x1xf32>
    %cst_175 = arith.constant 3.200000e+01 : f32
    %306 = vector.broadcast %cst_175 : f32 to vector<16x1xf32>
    %307 = arith.divf %305, %306 : vector<16x1xf32>
    %308 = vector.broadcast %307 : vector<16x1xf32> to vector<16x32xf32>
    %309 = arith.subf %299, %308 : vector<16x32xf32>
    %310 = arith.mulf %309, %309 : vector<16x32xf32>
    %cst_176 = arith.constant dense<0.000000e+00> : vector<16xf32>
    %311 = vector.multi_reduction <add>, %310, %cst_176 [1] : vector<16x32xf32> to vector<16xf32>
    %312 = vector.shape_cast %311 : vector<16xf32> to vector<16x1xf32>
    %cst_177 = arith.constant 3.200000e+01 : f32
    %313 = vector.broadcast %cst_177 : f32 to vector<16x1xf32>
    %314 = arith.divf %312, %313 : vector<16x1xf32>
    %315 = vector.broadcast %307 : vector<16x1xf32> to vector<16x32xf32>
    %316 = arith.subf %299, %315 : vector<16x32xf32>
    %cst_178 = arith.constant 9.99999996E-13 : f32
    %317 = vector.broadcast %cst_178 : f32 to vector<16x1xf32>
    %318 = arith.addf %314, %317 : vector<16x1xf32>
    %319 = math.rsqrt %318 : vector<16x1xf32>
    %320 = vector.broadcast %319 : vector<16x1xf32> to vector<16x32xf32>
    %321 = arith.mulf %316, %320 : vector<16x32xf32>
    %322 = vector.broadcast %301 : vector<1x32xf32> to vector<16x32xf32>
    %323 = arith.mulf %321, %322 : vector<16x32xf32>
    %324 = vector.broadcast %303 : vector<1x32xf32> to vector<16x32xf32>
    %325 = arith.addf %323, %324 : vector<16x32xf32>
    %c1_179 = arith.constant 1 : index
    %c0_180 = arith.constant 0 : index
    %c0_181 = arith.constant 0 : index
    %326 = vector.load %arg8[%c1_179, %c0_180, %c0_181] : memref<2x32x128xbf16, #tpu.memory_space<vmem>>, vector<1x32x128xbf16>
    %327 = vector.shape_cast %326 : vector<1x32x128xbf16> to vector<32x128xbf16>
    %328 = arith.truncf %325 : vector<16x32xf32> to vector<16x32xbf16>
    %cst_182 = arith.constant dense<0.000000e+00> : vector<16x128xf32>
    %329 = tpu.matmul %328, %327, %cst_182 {dimension_numbers = #tpu.dot_dimension_numbers<[1], [0], [0], [1], [0, 0, 1, 1], [], []>} : vector<16x32xbf16>, vector<32x128xbf16>, vector<16x128xf32> -> vector<16x128xf32>
    %c1_183 = arith.constant 1 : index
    %c0_184 = arith.constant 0 : index
    %c0_185 = arith.constant 0 : index
    %330 = vector.load %arg9[%c1_183, %c0_184, %c0_185] : memref<2x1x128xf32, #tpu.memory_space<vmem>>, vector<1x1x128xf32>
    %331 = vector.shape_cast %330 : vector<1x1x128xf32> to vector<1x128xf32>
    %332 = vector.broadcast %331 : vector<1x128xf32> to vector<16x128xf32>
    %333 = arith.addf %329, %332 : vector<16x128xf32>
    %334 = arith.mulf %333, %333 : vector<16x128xf32>
    %335 = arith.mulf %333, %334 : vector<16x128xf32>
    %cst_186 = arith.constant 4.471500e-02 : f32
    %336 = vector.broadcast %cst_186 : f32 to vector<16x128xf32>
    %337 = arith.mulf %336, %335 : vector<16x128xf32>
    %338 = arith.addf %333, %337 : vector<16x128xf32>
    %cst_187 = arith.constant 0.797884583 : f32
    %339 = vector.broadcast %cst_187 : f32 to vector<16x128xf32>
    %340 = arith.mulf %339, %338 : vector<16x128xf32>
    %341 = math.tanh %340 : vector<16x128xf32>
    %cst_188 = arith.constant 1.000000e+00 : f32
    %342 = vector.broadcast %cst_188 : f32 to vector<16x128xf32>
    %343 = arith.addf %342, %341 : vector<16x128xf32>
    %cst_189 = arith.constant 5.000000e-01 : f32
    %344 = vector.broadcast %cst_189 : f32 to vector<16x128xf32>
    %345 = arith.mulf %344, %343 : vector<16x128xf32>
    %346 = arith.mulf %333, %345 : vector<16x128xf32>
    %c1_190 = arith.constant 1 : index
    %c0_191 = arith.constant 0 : index
    %c0_192 = arith.constant 0 : index
    %347 = vector.load %arg10[%c1_190, %c0_191, %c0_192] : memref<2x128x32xbf16, #tpu.memory_space<vmem>>, vector<1x128x32xbf16>
    %348 = vector.shape_cast %347 : vector<1x128x32xbf16> to vector<128x32xbf16>
    %349 = arith.truncf %346 : vector<16x128xf32> to vector<16x128xbf16>
    %cst_193 = arith.constant dense<0.000000e+00> : vector<16x32xf32>
    %350 = tpu.matmul %349, %348, %cst_193 {dimension_numbers = #tpu.dot_dimension_numbers<[1], [0], [0], [1], [0, 0, 1, 1], [], []>} : vector<16x128xbf16>, vector<128x32xbf16>, vector<16x32xf32> -> vector<16x32xf32>
    %c1_194 = arith.constant 1 : index
    %c0_195 = arith.constant 0 : index
    %c0_196 = arith.constant 0 : index
    %351 = vector.load %arg11[%c1_194, %c0_195, %c0_196] : memref<2x1x32xf32, #tpu.memory_space<vmem>>, vector<1x1x32xf32>
    %352 = vector.shape_cast %351 : vector<1x1x32xf32> to vector<1x32xf32>
    %353 = vector.broadcast %352 : vector<1x32xf32> to vector<16x32xf32>
    %354 = arith.addf %350, %353 : vector<16x32xf32>
    %355 = arith.addf %325, %354 : vector<16x32xf32>
    %c8_197 = arith.constant 8 : index
    %c0_198 = arith.constant 0 : index
    %c0_199 = arith.constant 0 : index
    %356 = vector.load %arg3[%c8_197, %c0_198, %c0_199] : memref<10x1x32xf32, #tpu.memory_space<vmem>>, vector<1x1x32xf32>
    %357 = vector.shape_cast %356 : vector<1x1x32xf32> to vector<1x32xf32>
    %c9_200 = arith.constant 9 : index
    %c0_201 = arith.constant 0 : index
    %c0_202 = arith.constant 0 : index
    %358 = vector.load %arg3[%c9_200, %c0_201, %c0_202] : memref<10x1x32xf32, #tpu.memory_space<vmem>>, vector<1x1x32xf32>
    %359 = vector.shape_cast %358 : vector<1x1x32xf32> to vector<1x32xf32>
    %cst_203 = arith.constant dense<0.000000e+00> : vector<16xf32>
    %360 = vector.multi_reduction <add>, %355, %cst_203 [1] : vector<16x32xf32> to vector<16xf32>
    %361 = vector.shape_cast %360 : vector<16xf32> to vector<16x1xf32>
    %cst_204 = arith.constant 3.200000e+01 : f32
    %362 = vector.broadcast %cst_204 : f32 to vector<16x1xf32>
    %363 = arith.divf %361, %362 : vector<16x1xf32>
    %364 = vector.broadcast %363 : vector<16x1xf32> to vector<16x32xf32>
    %365 = arith.subf %355, %364 : vector<16x32xf32>
    %366 = arith.mulf %365, %365 : vector<16x32xf32>
    %cst_205 = arith.constant dense<0.000000e+00> : vector<16xf32>
    %367 = vector.multi_reduction <add>, %366, %cst_205 [1] : vector<16x32xf32> to vector<16xf32>
    %368 = vector.shape_cast %367 : vector<16xf32> to vector<16x1xf32>
    %cst_206 = arith.constant 3.200000e+01 : f32
    %369 = vector.broadcast %cst_206 : f32 to vector<16x1xf32>
    %370 = arith.divf %368, %369 : vector<16x1xf32>
    %371 = vector.broadcast %363 : vector<16x1xf32> to vector<16x32xf32>
    %372 = arith.subf %355, %371 : vector<16x32xf32>
    %cst_207 = arith.constant 9.99999996E-13 : f32
    %373 = vector.broadcast %cst_207 : f32 to vector<16x1xf32>
    %374 = arith.addf %370, %373 : vector<16x1xf32>
    %375 = math.rsqrt %374 : vector<16x1xf32>
    %376 = vector.broadcast %375 : vector<16x1xf32> to vector<16x32xf32>
    %377 = arith.mulf %372, %376 : vector<16x32xf32>
    %378 = vector.broadcast %357 : vector<1x32xf32> to vector<16x32xf32>
    %379 = arith.mulf %377, %378 : vector<16x32xf32>
    %380 = vector.broadcast %359 : vector<1x32xf32> to vector<16x32xf32>
    %381 = arith.addf %379, %380 : vector<16x32xf32>
    %382 = tpu.iota {dimensions = array<i32: 1>} : vector<2x16xi32>
    %383 = tpu.iota {dimensions = array<i32: 0>} : vector<2x16xi32>
    %c8_i32 = arith.constant 8 : i32
    %384 = vector.broadcast %c8_i32 : i32 to vector<2x16xi32>
    %385 = arith.muli %383, %384 : vector<2x16xi32>
    %c0_i32 = arith.constant 0 : i32
    %386 = vector.broadcast %c0_i32 : i32 to vector<2x16xi32>
    %387 = arith.addi %386, %385 : vector<2x16xi32>
    %388 = arith.cmpi eq, %382, %387 : vector<2x16xi32>
    %389 = arith.extui %388 : vector<2x16xi1> to vector<2x16xi32>
    %390 = arith.sitofp %389 : vector<2x16xi32> to vector<2x16xf32>
    %cst_208 = arith.constant dense<0.000000e+00> : vector<2x32xf32>
    %391 = tpu.matmul %390, %381, %cst_208 {dimension_numbers = #tpu.dot_dimension_numbers<[1], [0], [0], [1], [0, 0, 1, 1], [], []>} : vector<2x16xf32>, vector<16x32xf32>, vector<2x32xf32> -> vector<2x32xf32>
    %c0_209 = arith.constant 0 : index
    %c0_210 = arith.constant 0 : index
    %c0_211 = arith.constant 0 : index
    %392 = vector.load %arg12[%c0_209, %c0_210, %c0_211] : memref<2x32x32xbf16, #tpu.memory_space<vmem>>, vector<1x32x32xbf16>
    %393 = vector.shape_cast %392 : vector<1x32x32xbf16> to vector<32x32xbf16>
    %394 = arith.truncf %391 : vector<2x32xf32> to vector<2x32xbf16>
    %cst_212 = arith.constant dense<0.000000e+00> : vector<2x32xf32>
    %395 = tpu.matmul %394, %393, %cst_212 {dimension_numbers = #tpu.dot_dimension_numbers<[1], [0], [0], [1], [0, 0, 1, 1], [], []>} : vector<2x32xbf16>, vector<32x32xbf16>, vector<2x32xf32> -> vector<2x32xf32>
    %c0_213 = arith.constant 0 : index
    %c0_214 = arith.constant 0 : index
    %c0_215 = arith.constant 0 : index
    %396 = vector.load %arg13[%c0_213, %c0_214, %c0_215] : memref<2x1x32xf32, #tpu.memory_space<vmem>>, vector<1x1x32xf32>
    %397 = vector.shape_cast %396 : vector<1x1x32xf32> to vector<1x32xf32>
    %398 = vector.broadcast %397 : vector<1x32xf32> to vector<2x32xf32>
    %399 = arith.addf %395, %398 : vector<2x32xf32>
    %400 = math.tanh %399 : vector<2x32xf32>
    %c1_216 = arith.constant 1 : index
    %c0_217 = arith.constant 0 : index
    %c0_218 = arith.constant 0 : index
    %401 = vector.load %arg12[%c1_216, %c0_217, %c0_218] : memref<2x32x32xbf16, #tpu.memory_space<vmem>>, vector<1x32x32xbf16>
    %402 = vector.shape_cast %401 : vector<1x32x32xbf16> to vector<32x32xbf16>
    %403 = arith.truncf %400 : vector<2x32xf32> to vector<2x32xbf16>
    %cst_219 = arith.constant dense<0.000000e+00> : vector<2x32xf32>
    %404 = tpu.matmul %403, %402, %cst_219 {dimension_numbers = #tpu.dot_dimension_numbers<[1], [0], [0], [1], [0, 0, 1, 1], [], []>} : vector<2x32xbf16>, vector<32x32xbf16>, vector<2x32xf32> -> vector<2x32xf32>
    %c1_220 = arith.constant 1 : index
    %c0_221 = arith.constant 0 : index
    %c0_222 = arith.constant 0 : index
    %405 = vector.load %arg13[%c1_220, %c0_221, %c0_222] : memref<2x1x32xf32, #tpu.memory_space<vmem>>, vector<1x1x32xf32>
    %406 = vector.shape_cast %405 : vector<1x1x32xf32> to vector<1x32xf32>
    %407 = vector.broadcast %406 : vector<1x32xf32> to vector<2x32xf32>
    %408 = arith.addf %404, %407 : vector<2x32xf32>
    %409 = math.tanh %408 : vector<2x32xf32>
    %c0_223 = arith.constant 0 : index
    %c0_224 = arith.constant 0 : index
    %410 = vector.load %arg14[%c0_223, %c0_224] : memref<32x64xbf16, #tpu.memory_space<vmem>>, vector<32x64xbf16>
    %411 = arith.truncf %409 : vector<2x32xf32> to vector<2x32xbf16>
    %cst_225 = arith.constant dense<0.000000e+00> : vector<2x64xf32>
    %412 = tpu.matmul %411, %410, %cst_225 {dimension_numbers = #tpu.dot_dimension_numbers<[1], [0], [0], [1], [0, 0, 1, 1], [], []>} : vector<2x32xbf16>, vector<32x64xbf16>, vector<2x64xf32> -> vector<2x64xf32>
    %c0_226 = arith.constant 0 : index
    %c0_227 = arith.constant 0 : index
    %413 = vector.load %arg15[%c0_226, %c0_227] : memref<1x64xf32, #tpu.memory_space<vmem>>, vector<1x64xf32>
    %414 = vector.broadcast %413 : vector<1x64xf32> to vector<2x64xf32>
    %415 = arith.addf %412, %414 : vector<2x64xf32>
    %c0_228 = arith.constant 0 : index
    %c0_229 = arith.constant 0 : index
    %416 = vector.load %arg16[%c0_228, %c0_229] : memref<64x32xbf16, #tpu.memory_space<vmem>>, vector<64x32xbf16>
    %417 = arith.truncf %415 : vector<2x64xf32> to vector<2x64xbf16>
    %cst_230 = arith.constant dense<0.000000e+00> : vector<2x32xf32>
    %418 = tpu.matmul %417, %416, %cst_230 {dimension_numbers = #tpu.dot_dimension_numbers<[1], [0], [0], [1], [0, 0, 1, 1], [], []>} : vector<2x64xbf16>, vector<64x32xbf16>, vector<2x32xf32> -> vector<2x32xf32>
    %c0_231 = arith.constant 0 : index
    %c0_232 = arith.constant 0 : index
    %419 = vector.load %arg17[%c0_231, %c0_232] : memref<1x32xf32, #tpu.memory_space<vmem>>, vector<1x32xf32>
    %420 = vector.broadcast %419 : vector<1x32xf32> to vector<2x32xf32>
    %421 = arith.addf %418, %420 : vector<2x32xf32>
    %c0_233 = arith.constant 0 : index
    %c0_234 = arith.constant 0 : index
    %422 = vector.load %arg18[%c0_233, %c0_234] : memref<32x16xbf16, #tpu.memory_space<vmem>>, vector<32x16xbf16>
    %423 = arith.truncf %421 : vector<2x32xf32> to vector<2x32xbf16>
    %cst_235 = arith.constant dense<0.000000e+00> : vector<2x16xf32>
    %424 = tpu.matmul %423, %422, %cst_235 {dimension_numbers = #tpu.dot_dimension_numbers<[1], [0], [0], [1], [0, 0, 1, 1], [], []>} : vector<2x32xbf16>, vector<32x16xbf16>, vector<2x16xf32> -> vector<2x16xf32>
    %c0_236 = arith.constant 0 : index
    %c0_237 = arith.constant 0 : index
    %425 = vector.load %arg19[%c0_236, %c0_237] : memref<1x16xf32, #tpu.memory_space<vmem>>, vector<1x16xf32>
    %426 = vector.broadcast %425 : vector<1x16xf32> to vector<2x16xf32>
    %427 = arith.addf %424, %426 : vector<2x16xf32>
    %c0_238 = arith.constant 0 : index
    %c0_239 = arith.constant 0 : index
    %428 = vector.load %arg20[%c0_238, %c0_239] : memref<16x128xbf16, #tpu.memory_space<vmem>>, vector<16x128xbf16>
    %429 = arith.truncf %427 : vector<2x16xf32> to vector<2x16xbf16>
    %cst_240 = arith.constant dense<0.000000e+00> : vector<2x128xf32>
    %430 = tpu.matmul %429, %428, %cst_240 {dimension_numbers = #tpu.dot_dimension_numbers<[1], [0], [0], [1], [0, 0, 1, 1], [], []>} : vector<2x16xbf16>, vector<16x128xbf16>, vector<2x128xf32> -> vector<2x128xf32>
    %c0_241 = arith.constant 0 : index
    %c0_242 = arith.constant 0 : index
    %431 = vector.load %arg21[%c0_241, %c0_242] : memref<1x128xf32, #tpu.memory_space<vmem>>, vector<1x128xf32>
    %432 = vector.broadcast %431 : vector<1x128xf32> to vector<2x128xf32>
    %433 = arith.addf %430, %432 : vector<2x128xf32>
    %c0_243 = arith.constant 0 : index
    %c0_244 = arith.constant 0 : index
    %434 = vector.load %arg22[%c0_243, %c0_244] : memref<2x128xf32, #tpu.memory_space<vmem>>, vector<2x128xf32>
    tpu.vector_store %arg22[%c0_243, %c0_244], %433 {strides = array<i32>} : memref<2x128xf32, #tpu.memory_space<vmem>>, vector<2x128xf32>,
    return
  }
  func.func @transform_0(%arg0: i32) -> (i32, i32) {
    %c0_i32 = arith.constant 0 : i32
    %c0_i32_0 = arith.constant 0 : i32
    %c0_i32_1 = arith.constant 0 : i32
    return %c0_i32, %c0_i32_0 : i32, i32
  }
  func.func @transform_1(%arg0: i32) -> (i32, i32) {
    %c0_i32 = arith.constant 0 : i32
    %c0_i32_0 = arith.constant 0 : i32
    %c0_i32_1 = arith.constant 0 : i32
    return %c0_i32, %c0_i32_0 : i32, i32
  }
  func.func @transform_2(%arg0: i32) -> (i32, i32, i32) {
    %c0_i32 = arith.constant 0 : i32
    %c0_i32_0 = arith.constant 0 : i32
    %c0_i32_1 = arith.constant 0 : i32
    %c0_i32_2 = arith.constant 0 : i32
    return %c0_i32, %c0_i32_0, %c0_i32_1 : i32, i32, i32
  }
  func.func @transform_3(%arg0: i32) -> (i32, i32, i32) {
    %c0_i32 = arith.constant 0 : i32
    %c0_i32_0 = arith.constant 0 : i32
    %c0_i32_1 = arith.constant 0 : i32
    %c0_i32_2 = arith.constant 0 : i32
    return %c0_i32, %c0_i32_0, %c0_i32_1 : i32, i32, i32
  }
  func.func @transform_4(%arg0: i32) -> (i32, i32, i32) {
    %c0_i32 = arith.constant 0 : i32
    %c0_i32_0 = arith.constant 0 : i32
    %c0_i32_1 = arith.constant 0 : i32
    %c0_i32_2 = arith.constant 0 : i32
    return %c0_i32, %c0_i32_0, %c0_i32_1 : i32, i32, i32
  }
  func.func @transform_5(%arg0: i32) -> (i32, i32, i32) {
    %c0_i32 = arith.constant 0 : i32
    %c0_i32_0 = arith.constant 0 : i32
    %c0_i32_1 = arith.constant 0 : i32
    %c0_i32_2 = arith.constant 0 : i32
    return %c0_i32, %c0_i32_0, %c0_i32_1 : i32, i32, i32
  }
  func.func @transform_6(%arg0: i32) -> (i32, i32, i32) {
    %c0_i32 = arith.constant 0 : i32
    %c0_i32_0 = arith.constant 0 : i32
    %c0_i32_1 = arith.constant 0 : i32
    %c0_i32_2 = arith.constant 0 : i32
    return %c0_i32, %c0_i32_0, %c0_i32_1 : i32, i32, i32
  }
  func.func @transform_7(%arg0: i32) -> (i32, i32, i32) {
    %c0_i32 = arith.constant 0 : i32
    %c0_i32_0 = arith.constant 0 : i32
    %c0_i32_1 = arith.constant 0 : i32
    %c0_i32_2 = arith.constant 0 : i32
    return %c0_i32, %c0_i32_0, %c0_i32_1 : i32, i32, i32
  }
  func.func @transform_8(%arg0: i32) -> (i32, i32, i32) {
    %c0_i32 = arith.constant 0 : i32
    %c0_i32_0 = arith.constant 0 : i32
    %c0_i32_1 = arith.constant 0 : i32
    %c0_i32_2 = arith.constant 0 : i32
    return %c0_i32, %c0_i32_0, %c0_i32_1 : i32, i32, i32
  }
  func.func @transform_9(%arg0: i32) -> (i32, i32, i32) {
    %c0_i32 = arith.constant 0 : i32
    %c0_i32_0 = arith.constant 0 : i32
    %c0_i32_1 = arith.constant 0 : i32
    %c0_i32_2 = arith.constant 0 : i32
    return %c0_i32, %c0_i32_0, %c0_i32_1 : i32, i32, i32
  }
  func.func @transform_10(%arg0: i32) -> (i32, i32, i32) {
    %c0_i32 = arith.constant 0 : i32
    %c0_i32_0 = arith.constant 0 : i32
    %c0_i32_1 = arith.constant 0 : i32
    %c0_i32_2 = arith.constant 0 : i32
    return %c0_i32, %c0_i32_0, %c0_i32_1 : i32, i32, i32
  }
  func.func @transform_11(%arg0: i32) -> (i32, i32, i32) {
    %c0_i32 = arith.constant 0 : i32
    %c0_i32_0 = arith.constant 0 : i32
    %c0_i32_1 = arith.constant 0 : i32
    %c0_i32_2 = arith.constant 0 : i32
    return %c0_i32, %c0_i32_0, %c0_i32_1 : i32, i32, i32
  }
  func.func @transform_12(%arg0: i32) -> (i32, i32, i32) {
    %c0_i32 = arith.constant 0 : i32
    %c0_i32_0 = arith.constant 0 : i32
    %c0_i32_1 = arith.constant 0 : i32
    %c0_i32_2 = arith.constant 0 : i32
    return %c0_i32, %c0_i32_0, %c0_i32_1 : i32, i32, i32
  }
  func.func @transform_13(%arg0: i32) -> (i32, i32) {
    %c0_i32 = arith.constant 0 : i32
    %c0_i32_0 = arith.constant 0 : i32
    %c0_i32_1 = arith.constant 0 : i32
    return %c0_i32, %c0_i32_0 : i32, i32
  }
  func.func @transform_14(%arg0: i32) -> (i32, i32) {
    %c0_i32 = arith.constant 0 : i32
    %c0_i32_0 = arith.constant 0 : i32
    %c0_i32_1 = arith.constant 0 : i32
    return %c0_i32, %c0_i32_0 : i32, i32
  }
  func.func @transform_15(%arg0: i32) -> (i32, i32) {
    %c0_i32 = arith.constant 0 : i32
    %c0_i32_0 = arith.constant 0 : i32
    %c0_i32_1 = arith.constant 0 : i32
    return %c0_i32, %c0_i32_0 : i32, i32
  }
  func.func @transform_16(%arg0: i32) -> (i32, i32) {
    %c0_i32 = arith.constant 0 : i32
    %c0_i32_0 = arith.constant 0 : i32
    %c0_i32_1 = arith.constant 0 : i32
    return %c0_i32, %c0_i32_0 : i32, i32
  }
  func.func @transform_17(%arg0: i32) -> (i32, i32) {
    %c0_i32 = arith.constant 0 : i32
    %c0_i32_0 = arith.constant 0 : i32
    %c0_i32_1 = arith.constant 0 : i32
    return %c0_i32, %c0_i32_0 : i32, i32
  }
  func.func @transform_18(%arg0: i32) -> (i32, i32) {
    %c0_i32 = arith.constant 0 : i32
    %c0_i32_0 = arith.constant 0 : i32
    %c0_i32_1 = arith.constant 0 : i32
    return %c0_i32, %c0_i32_0 : i32, i32
  }
  func.func @transform_19(%arg0: i32) -> (i32, i32) {
    %c0_i32 = arith.constant 0 : i32
    %c0_i32_0 = arith.constant 0 : i32
    %c0_i32_1 = arith.constant 0 : i32
    return %c0_i32, %c0_i32_0 : i32, i32
  }
  func.func @transform_20(%arg0: i32) -> (i32, i32) {
    %c0_i32 = arith.constant 0 : i32
    %c0_i32_0 = arith.constant 0 : i32
    %c0_i32_1 = arith.constant 0 : i32
    return %c0_i32, %c0_i32_0 : i32, i32
  }
  func.func @transform_21(%arg0: i32) -> (i32, i32) {
    %c0_i32 = arith.constant 0 : i32
    %c0_i32_0 = arith.constant 0 : i32
    %c0_i32_1 = arith.constant 0 : i32
    return %c0_i32, %c0_i32_0 : i32, i32
  }
}

</mosaic_0001>

<bundles_post_ra>
// kernel: predict_sentiment.1
= control target key start
LH: loop header
LB: loop body
LE: loop exit
PB: predicated region body
PF: predicated region fallthrough
CT: control target
= control target key end

     0   :  { %s3036_s0 = inlined_call_operand.vmem [shape: f32[16,32], index: 0, kind: input, shape index: {}]   ;;  %s3037_s1 = inlined_call_operand.vmem [shape: f32[16,16], index: 1, kind: input, shape index: {}]   ;;  %s3038_s2 = inlined_call_operand.hbm [shape: f32[10,1,32], index: 2, kind: input, shape index: {}]   ;;  %s3039_s3 = inlined_call_operand.vmem [shape: bf16[12,32,16], index: 3, kind: input, shape index: {}]   ;;  %s3040_s4 = inlined_call_operand.vmem [shape: f32[12,1,16], index: 4, kind: input, shape index: {}]   ;;  %s3041_s5 = inlined_call_operand.hbm [shape: bf16[4,16,32], index: 5, kind: input, shape index: {}]   ;;  %s3042_s6 = inlined_call_operand.vmem [shape: f32[2,1,32], index: 6, kind: input, shape index: {}, may-alias: {6,10,12}]   ;;  %s3043_s7 = inlined_call_operand.hbm [shape: bf16[2,32,128], index: 7, kind: input, shape index: {}]   ;;  %s3044_s8 = inlined_call_operand.vmem [shape: f32[2,1,128], index: 8, kind: input, shape index: {}]   ;;  %s3045_s9 = inlined_call_operand.hbm [shape: bf16[2,128,32], index: 9, kind: input, shape index: {}]   ;;  %s3046_s10 = inlined_call_operand.vmem [shape: f32[2,1,32], index: 10, kind: input, shape index: {}, may-alias: {6,10,12}]   ;;  %s3047_s11 = inlined_call_operand.hbm [shape: bf16[2,32,32], index: 11, kind: input, shape index: {}]   ;;  %s3048_s12 = inlined_call_operand.vmem [shape: f32[2,1,32], index: 12, kind: input, shape index: {}, may-alias: {6,10,12}]   ;;  %s3049_s13 = inlined_call_operand.hbm [shape: bf16[32,64], index: 13, kind: input, shape index: {}]   ;;  %s3050_s14 = inlined_call_operand.vmem [shape: f32[1,64], index: 14, kind: input, shape index: {}]   ;;  %s3051_s15 = inlined_call_operand.vmem [shape: bf16[64,32], index: 15, kind: input, shape index: {}]   ;;  %s3052_s16 = inlined_call_operand.vmem [shape: f32[1,32], index: 16, kind: input, shape index: {}]   ;;  %s3053_s17 = inlined_call_operand.vmem [shape: bf16[32,16], index: 17, kind: input, shape index: {}]   ;;  %s3054_s18 = inlined_call_operand.vmem [shape: f32[1,16], index: 18, kind: input, shape index: {}]   ;;  %s3055_s19 = inlined_call_operand.vmem [shape: bf16[16,128], index: 19, kind: input, shape index: {}]   ;;  %s3056_s20 = inlined_call_operand.vmem [shape: f32[1,128], index: 20, kind: input, shape index: {}]   ;;  %s3057_s21 = inlined_call_operand.hbm [shape: f32[2,128], index: 21, kind: output, shape index: {}]  }
   0x1   :  { %3062 = sst [smem:[#allocation19_spill]] %s3036_s0 }
   0x2   :  { %3063 = sst [smem:[#allocation20_spill]] %s3037_s1 }
   0x3   :  { %3064 = sst [smem:[#allocation21_spill]] %s3038_s2 }
   0x4   :  { %3065 = sst [smem:[#allocation22_spill]] %s3039_s3 }
   0x5   :  { %3066 = sst [smem:[#allocation23_spill]] %s3040_s4 }
   0x6   :  { %3067 = sst [smem:[#allocation24_spill]] %s3041_s5 }
   0x7   :  { %3068 = sst [smem:[#allocation25_spill]] %s3057_s21 }
   0x8   :  { %26 = vsyncpa [#allocation3], 0 }
   0x9   :  { %27 = vsyncpa [#allocation6], 0 }
   0xa   :  { %28 = vsyncpa [#allocation9], 0 }
   0xb   :  { %29 = vsyncpa [#allocation12], 0  ;;  %s3069_s26 = sld [smem:[#allocation24_spill]] }
  0x11   :  { %s56_s27 = sshll.u32 %s3069_s26, 4  ;;  %s57_s27 = int_to_ptr.hbm [resolvable:$true] %s56_s27 }
  0x12   :  { %30 = vsyncpa [#allocation4], 0  ;;  %s2562_s3 = smov [#allocation5]   ;;  %s86_s4 = sshll.u32 %s3045_s9, 4  ;;  %s87_s4 = int_to_ptr.hbm [resolvable:$true] %s86_s4 }
  0x13   :  { %s58_s28 = sshll.u32 %s2562_s3, 4  ;;  %s2563_s30 = smov 64   ;;  %s59_s28 = int_to_ptr.vmem [resolvable:$true] %s58_s28 }
  0x14   :  { %s2564_s5 = smov 4   ;;  %s2565_s22 = smov [#allocation8]  }
  0x15   :  { %64 = dma.hbm_to_vmem [thread:$0]  %s57_s27, 512, %s59_s28, [#allocation6], %s2563_s30, %s2563_s30, %s2564_s5  }
  0x16   :  { %s88_s23 = sshll.u32 %s2565_s22, 4  ;;  %s3070_s2 = sld [smem:[#allocation21_spill]]  ;;  %s89_s23 = int_to_ptr.vmem [resolvable:$true] %s88_s23 }
  0x17   :  { %94 = dma.hbm_to_vmem [thread:$0]  %s87_s4, 2048, %s89_s23, [#allocation9], %s2563_s30, %s2563_s30, %s2564_s5  }
  0x18   :  { %s2566_s9 = smov [#allocation2]   ;;  %s71_s27 = sshll.u32 %s3043_s7, 4  ;;  %s72_s27 = int_to_ptr.hbm [resolvable:$true] %s71_s27 }
  0x19   :  { %s41_s26 = sshll.u32 %s2566_s9, 4  ;;  %s2567_s28 = smov 16   ;;  %s42_s26 = int_to_ptr.vmem [resolvable:$true] %s41_s26 }
  0x1a   :  { %s2568_s0 = smov 1   ;;  %s2569_s22 = smov [#allocation7]  }
  0x1b   :  { %s73_s1 = sshll.u32 %s2569_s22, 4  ;;  %s101_s21 = sshll.u32 %s3047_s11, 4  ;;  %s74_s1 = int_to_ptr.vmem [resolvable:$true] %s73_s1  ;;  %s102_s21 = int_to_ptr.hbm [resolvable:$true] %s101_s21 }
  0x1c   :  { %s39_s25 = sshll.u32 %s3070_s2, 4  ;;  %s116_s7 = sshll.u32 %s3049_s13, 4  ;;  %s40_s25 = int_to_ptr.hbm [resolvable:$true] %s39_s25  ;;  %s117_s7 = int_to_ptr.hbm [resolvable:$true] %s116_s7 }
  0x1d   :  { %47 = dma.hbm_to_vmem [thread:$0]  %s40_s25, 160, %s42_s26, [#allocation3], %s2567_s28, %s2567_s28, %s2568_s0  }
  0x1e   :  { %79 = dma.hbm_to_vmem [thread:$0]  %s72_s27, 512, %s74_s1, [#allocation6], %s2563_s30, %s2563_s30, %s2564_s5  }
  0x1f   :  { %s2570_s9 = smov [#allocation10]   ;;  %s2571_s25 = smov [#allocation11]  }
  0x20   :  { %s103_s3 = sshll.u32 %s2570_s9, 4  ;;  %s118_s11 = sshll.u32 %s2571_s25, 4  ;;  %s104_s3 = int_to_ptr.vmem [resolvable:$true] %s103_s3  ;;  %s119_s11 = int_to_ptr.vmem [resolvable:$true] %s118_s11 }
  0x21   :  { %109 = dma.hbm_to_vmem [thread:$0]  %s102_s21, 512, %s104_s3, [#allocation9], %s2563_s30, %s2563_s30, %s2564_s5  }
  0x22   :  { %124 = dma.hbm_to_vmem [thread:$0]  %s117_s7, 256, %s119_s11, [#allocation12], %s2563_s30, %s2563_s30, %s2564_s5  }
  0x23   :  { %2552 = dma.done.wait [#allocation3], 160  }
  0x24   :  { %2553 = vsyncadd [#allocation3], 4294967136 }
  0x25   :  { %2554 = dma.done.wait [#allocation6], 1024  }
  0x26   :  { %2555 = vsyncadd [#allocation6], 4294966272 }
  0x27   :  { %2556 = dma.done.wait [#allocation9], 2560  }
  0x28   :  { %2557 = vsyncadd [#allocation9], 4294964736 }
  0x29   :  { %2558 = dma.done.wait [#allocation12], 256  }
  0x2a   :  { %2559 = vsyncadd [#allocation12], 4294967040  ;;  %vm171_vm0 = vcmask 261120   ;;  %s3071_s29 = sld [smem:[#allocation19_spill]]  ;;  %v2572_v4 = vmov 32.0   ;;  %vm346_vm8 = vcmask 130048  }
  0x2b   :  { %2318 = vrcp.f32 %v2572_v4  ;;  %s3072_s28 = sld [smem:[#allocation22_spill]]  ;;  %v2284_v47 = vld [vmem:[#allocation2] ss:$0 sm:$0xff]  ;;  %v2285_v51 = vld [vmem:[#allocation2 + $0x1] ss:$0 sm:$0xff] }
  0x2c   :  { %s3073_s27 = sld [smem:[#allocation23_spill]] }
  0x2d   :  { %s3074_s9 = sld [smem:[#allocation20_spill]] }
  0x2e   :  { %s3075_s11 = sld [smem:[#allocation25_spill]] }
  0x30   :  { %v164_v0 = vld [vmem:[%s3071_s29] sm:$0xff]  ;;  %v165_v1 = vld [vmem:[%s3071_s29 + $0x8] sm:$0xff] }
  0x31   :  { %v172_v2 = vsel %vm171_vm0, %v164_v0, 0.0  ;;  %v175_v3 = vsel %vm171_vm0, %v165_v1, 0.0  ;;  %v2319_v5 = vpop.eup %2318  ;;  %v2211_v21 = vld [vmem:[%s3072_s28 + $0x8] sm:$0xff]  ;;  %v2210_v26 = vld [vmem:[%s3072_s28] sm:$0xff]  ;;  %v2218_v31 = vld [vmem:[%s3072_s28 + $0x18] sm:$0xff] }
  0x32   :  { %173 = vadd.xlane.f32.xlu0 %v172_v2  ;;  %v179_v6 = vmul.f32 32.0, %v2319_v5  ;;  %vm183_vm1 = vweird.f32 %v2319_v5  ;;  %v2213_v22 = vld [vmem:[%s3072_s28 + $0x28] sm:$0xff]  ;;  %264 = vmatpush.bf16.msra.mxu0 %v2211_v21  ;;  %v2212_v27 = vld [vmem:[%s3072_s28 + $0x20] sm:$0xff]  ;;  %v2217_v33 = vld [vmem:[%s3072_s28 + $0x10] sm:$0xff] }
  0x33   :  { %v2215_v23 = vld [vmem:[%s3072_s28 + $0x48] sm:$0xff]  ;;  %300 = vmatpush.bf16.msra.mxu1 %v2213_v22  ;;  %v2214_v28 = vld [vmem:[%s3072_s28 + $0x40] sm:$0xff]  ;;  %v2220_v2 = vld [vmem:[%s3072_s28 + $0x38] sm:$0xff] }
  0x34   :  { %v180_v7 = vsub.f32 1.0, %v179_v6  ;;  %336 = vmatpush.bf16.msra.mxu2 %v2215_v23  ;;  %v2287_v60 = vld [vmem:[%s3073_s27 + $0x2] ss:$0 sm:$0xff]  ;;  %v2803_v23 = vld [vmem:[%s3074_s9 + $0x8] sm:$0xff]  ;;  %s1860_s13 = sshll.u32 %s3075_s11, 4  ;;  %s1861_s13 = int_to_ptr.hbm [resolvable:$true] %s1860_s13 }
  0x36   :  { %v181_v8 = vmul.f32 %v2319_v5, %v180_v7  ;;  %265 = vmatpush.bf16.msra.mxu0 %v2210_v26 }
  0x37   :  { %301 = vmatpush.bf16.msra.mxu1 %v2212_v27 }
  0x38   :  { %v182_v9 = vadd.f32 %v2319_v5, %v181_v8  ;;  %337 = vmatpush.bf16.msra.mxu2 %v2214_v28  ;;  %v2290_v28 = vld [vmem:[%s3073_s27 + $0x3] ss:$0 sm:$0xff] }
  0x3a   :  { %176 = vadd.xlane.f32.xlu0 %v175_v3  ;;  %v2726_v10 = vsel %vm183_vm1, %v2319_v5, %v182_v9  ;;  %v2288_v3 = vld [vmem:[%s3073_s27 + $0x4] ss:$0 sm:$0xff]  ;;  %v2286_v5 = vld [vmem:[%s3073_s27] ss:$0 sm:$0xff]  ;;  %v2219_v9 = vld [vmem:[%s3072_s28 + $0x30] sm:$0xff] }
  0x3c   :  { %471 = vmatpush.bf16.msrb.mxu2 %v2218_v31 }
  0x40   :  { %472 = vmatpush.bf16.msrb.mxu2 %v2217_v33 }
  0xa5   :  { %v174_v11 = vpop.xlane.xlu0 %173 }
  0xa6   :  { %v185_v12 = vmul.f32 %v2726_v10, %v174_v11 }
  0xa8   :  { %v187_v13 = vsub.f32 %v164_v0, %v185_v12 }
  0xaa   :  { %v189_v14 = vmul.f32 %v187_v13, %v187_v13 }
  0xac   :  { %v191_v15 = vsel %vm171_vm0, %v189_v14, 0.0 }
  0xad   :  { %192 = vadd.xlane.f32.xlu1 %v191_v15  ;;  %v177_v16 = vpop.xlane.xlu0 %176 }
  0xae   :  { %v186_v17 = vmul.f32 %v2726_v10, %v177_v16  ;;  %v2216_v16 = vld [vmem:[#allocation5] sm:$0xff] }
  0xaf   :  { %431 = vmatpush.bf16.msrb.mxu1 %v2216_v16 }
  0xb0   :  { %v188_v18 = vsub.f32 %v165_v1, %v186_v17 }
  0xb2   :  { %v190_v19 = vmul.f32 %v188_v18, %v188_v18 }
  0xb4   :  { %v194_v20 = vsel %vm171_vm0, %v190_v19, 0.0 }
  0xb5   :  { %195 = vadd.xlane.f32.xlu1 %v194_v20 }
 0x120   :  { %v193_v24 = vpop.xlane.xlu1 %192 }
 0x121   :  { %v197_v25 = vmul.f32 %v193_v24, %v2726_v10 }
 0x123   :  { %v199_v29 = vadd.f32 1e-12, %v197_v25 }
 0x125   :  { %2320 = vrsqrt.f32 %v199_v29  ;;  %vm207_vm3 = vweird.f32 %v199_v29 }
 0x128   :  { %v196_v30 = vpop.xlane.xlu1 %195 }
 0x129   :  { %v198_v32 = vmul.f32 %v196_v30, %v2726_v10 }
 0x12b   :  { %v2321_v34 = vpop.eup %2320  ;;  %v200_v35 = vadd.f32 1e-12, %v198_v32 }
 0x12c   :  { %v202_v36 = vmul.f32 %v2321_v34, %v199_v29  ;;  %vm208_vm2 = vweird.f32 %v2321_v34 }
 0x12d   :  { %2322 = vrsqrt.f32 %v200_v35  ;;  %vm209_vm4 = vmor %vm207_vm3, %vm208_vm2  ;;  %vm217_vm6 = vweird.f32 %v200_v35 }
 0x12e   :  { %v203_v37 = vmul.f32 %v2321_v34, %v202_v36 }
 0x130   :  { %v204_v38 = vmul.f32 0.5, %v203_v37 }
 0x132   :  { %v205_v39 = vsub.f32 1.5, %v204_v38 }
 0x133   :  { %v2323_v40 = vpop.eup %2322 }
 0x134   :  { %v206_v41 = vmul.f32 %v2321_v34, %v205_v39  ;;  %v212_v42 = vmul.f32 %v2323_v40, %v200_v35  ;;  %vm218_vm5 = vweird.f32 %v2323_v40 }
 0x135   :  { %vm219_vm7 = vmor %vm217_vm6, %vm218_vm5 }
 0x136   :  { %v213_v43 = vmul.f32 %v2323_v40, %v212_v42  ;;  %v210_v44 = vsel %vm209_vm4, %v2321_v34, %v206_v41 }
 0x137   :  { %v221_v48 = vmul.f32 %v210_v44, %v187_v13  ;;  %v2222_v44 = vld [vmem:[%s3072_s28 + $0x58] sm:$0xff] }
 0x138   :  { %v214_v45 = vmul.f32 0.5, %v213_v43 }
 0x139   :  { %v226_v52 = vmul.f32 %v2284_v47, %v221_v48 }
 0x13a   :  { %v215_v46 = vsub.f32 1.5, %v214_v45  ;;  %v2221_v45 = vld [vmem:[%s3072_s28 + $0x50] sm:$0xff] }
 0x13b   :  { %v2758_v55 = vadd.f32 %v2285_v51, %v226_v52 }
 0x13c   :  { %v216_v49 = vmul.f32 %v2323_v40, %v215_v46 }
 0x13e   :  { %v220_v50 = vsel %vm219_vm7, %v2323_v40, %v216_v49 }
 0x13f   :  { %v222_v53 = vmul.f32 %v220_v50, %v188_v18  ;;  %v2796_v18 = vld [vmem:[%s3074_s9] sm:$0xff] }
 0x141   :  { %v227_v54 = vmul.f32 %v2284_v47, %v222_v53 }
 0x143   :  { %v2760_v56 = vadd.f32 %v2285_v51, %v227_v54 }
 0x145   :  { %v2764_v57 = vpack.c.bf16 %v2760_v56, %v2758_v55 }
 0x147   :  { %1881 = vmatmul.msk.bf16.vlgmr.msra.gmra.mxu0 %vm171_vm0, %v2764_v57  ;;  %1895 = vmatmul.msk.bf16.vlgmr.msra.gmra.mxu1 %vm171_vm0, %v2764_v57 }
 0x148   :  { %1909 = vmatmul.msk.bf16.vlgmr.msra.gmra.mxu2 %vm171_vm0, %v2764_v57 }
 0x158   :  { %1930 = vmatmul.msk.bf16.vlgmr.msrb.gmra.mxu2 %vm171_vm0, %v2764_v57 }
 0x1c4   :  { %v303_v58 = vpop.f32.mrf.mxu1  ;;  %v267_v59 = vpop.f32.mrf.mxu0 }
 0x1c5   :  { %v304_v63 = vadd.f32 %v2287_v60, %v303_v58  ;;  %v268_v13 = vadd.f32 %v2286_v5, %v267_v59 }
 0x1cb   :  { %v339_v61 = vpop.f32.mrf.mxu2 }
 0x1cc   :  { %v305_v62 = vpop.f32.mrf.mxu1  ;;  %v269_v4 = vpop.f32.mrf.mxu0  ;;  %v340_v11 = vadd.f32 %v2288_v3, %v339_v61 }
 0x1cd   :  { %v306_v0 = vadd.f32 %v2287_v60, %v305_v62  ;;  %v270_v7 = vadd.f32 %v2286_v5, %v269_v4  ;;  %v2289_v62 = vld [vmem:[%s3073_s27 + $0x1] ss:$0 sm:$0xff] }
 0x1cf   :  { %v345_v1 = vpack.c.bf16 %v306_v0, %v304_v63  ;;  %v344_v15 = vpack.c.bf16 %v270_v7, %v268_v13  ;;  %v2291_v0 = vld [vmem:[%s3073_s27 + $0x5] ss:$0 sm:$0xff] }
 0x1d1   :  { %v351_v6 = vsel %vm346_vm8, %v345_v1, 0 }
 0x1d2   :  { %360 = vmatpush.bf16.xpose.msra.mxu3 %v351_v6 }
 0x1d3   :  { %v341_v8 = vpop.f32.mrf.mxu2 }
 0x1d4   :  { %v342_v12 = vadd.f32 %v2288_v3, %v341_v8 }
 0x1d6   :  { %v394_v14 = vpack.c.bf16 %v342_v12, %v340_v11 }
 0x1d8   :  { %405 = vmatpush.bf16.msrb.mxu0 %v394_v14 }
 0x1d9   :  { %1910 = vmatmul.msk.bf16.vlgmr.msra.gmra.mxu3 %vm346_vm8, %v344_v15 }
 0x1da   :  { %507 = vmatpush.bf16.msrb.mxu3 %v2220_v2 }
 0x1db   :  { %v474_v54 = vpop.f32.mrf.mxu2 }
 0x1dc   :  { %543 = vmatpush.bf16.msra.mxu0 %v2222_v44  ;;  %v475_v1 = vadd.f32 %v2289_v62, %v474_v54 }
 0x1de   :  { %508 = vmatpush.bf16.msrb.mxu3 %v2219_v9 }
 0x1e0   :  { %544 = vmatpush.bf16.msra.mxu0 %v2221_v45 }
 0x1e3   :  { %v476_v61 = vpop.f32.mrf.mxu2 }
 0x1e4   :  { %v477_v63 = vadd.f32 %v2289_v62, %v476_v61 }
 0x1e9   :  { %1944 = vmatmul.msk.bf16.vlgmr.msrb.gmra.mxu3 %vm171_vm0, %v2764_v57 }
 0x25c   :  { %v362_v17 = vpop.f32.mrf.mxu3 }
 0x25d   :  { %v367_v19 = vmul.f32 0.25, %v362_v17 }
 0x25f   :  { %v369_v20 = vadd.f32 %v367_v19, %v2796_v18 }
 0x261   :  { %v371_v21 = vsel %vm346_vm8, %v369_v20, -inf }
 0x262   :  { %372 = vmax.xlane.f32.xlu2 %v371_v21 }
 0x264   :  { %v364_v22 = vpop.f32.mrf.mxu3 }
 0x265   :  { %v368_v24 = vmul.f32 0.25, %v364_v22 }
 0x267   :  { %v370_v25 = vadd.f32 %v368_v24, %v2803_v23 }
 0x269   :  { %v374_v26 = vsel %vm346_vm8, %v370_v25, -inf }
 0x26a   :  { %375 = vmax.xlane.f32.xlu2 %v374_v26 }
 0x26c   :  { %v510_v27 = vpop.f32.mrf.mxu3 }
 0x26d   :  { %v511_v30 = vadd.f32 %v2290_v28, %v510_v27 }
 0x274   :  { %v512_v29 = vpop.f32.mrf.mxu3 }
 0x275   :  { %v513_v31 = vadd.f32 %v2290_v28, %v512_v29 }
 0x277   :  { %v552_v32 = vpack.c.bf16 %v513_v31, %v511_v30 }
 0x279   :  { %v557_v33 = vsel %vm346_vm8, %v552_v32, 0 }
 0x27a   :  { %566 = vmatpush.bf16.xpose.msra.mxu1 %v557_v33 }
 0x2d5   :  { %v373_v34 = vpop.xlane.xlu2 %372 }
 0x2d6   :  { %v377_v35 = vsub.f32 %v369_v20, %v373_v34 }
 0x2d8   :  { %v379_v36 = vmul.f32 1.442695, %v377_v35 }
 0x2da   :  { %2324 = vpow2.f32 %v379_v36  ;;  %v2223_v36 = vld [vmem:[#allocation5 + $0x8] sm:$0xff] }
 0x2db   :  { %638 = vmatpush.bf16.msra.mxu3 %v2223_v36  ;;  %v2228_v36 = vld [vmem:[#allocation8 + $0x10] sm:$0xff] }
 0x2dd   :  { %v376_v37 = vpop.xlane.xlu2 %375 }
 0x2de   :  { %v378_v38 = vsub.f32 %v370_v25, %v376_v37 }
 0x2e0   :  { %v2325_v39 = vpop.eup %2324  ;;  %v381_v40 = vmul.f32 1.442695, %v378_v38 }
 0x2e1   :  { %v383_v41 = vsel %vm346_vm8, %v2325_v39, 0.0 }
 0x2e2   :  { %2326 = vpow2.f32 %v381_v40  ;;  %384 = vadd.xlane.f32.xlu0 %v383_v41  ;;  %v2292_v40 = vld [vmem:[%s3042_s6] ss:$0 sm:$0xff] }
 0x2e8   :  { %v2327_v42 = vpop.eup %2326 }
 0x2e9   :  { %v386_v43 = vsel %vm346_vm8, %v2327_v42, 0.0 }
 0x2ea   :  { %387 = vadd.xlane.f32.xlu1 %v386_v43 }
 0x355   :  { %v385_v46 = vpop.xlane.xlu0 %384 }
 0x356   :  { %2328 = vrcp.f32 %v385_v46 }
 0x35c   :  { %v2329_v48 = vpop.eup %2328 }
 0x35d   :  { %v388_v47 = vpop.xlane.xlu1 %387  ;;  %v391_v50 = vmul.f32 %v2329_v48, %v2325_v39 }
 0x35e   :  { %2330 = vrcp.f32 %v388_v47 }
 0x364   :  { %v2331_v49 = vpop.eup %2330 }
 0x365   :  { %v392_v51 = vmul.f32 %v2331_v49, %v2327_v42 }
 0x367   :  { %v393_v52 = vpack.c.bf16 %v392_v51, %v391_v50 }
 0x369   :  { %1911 = vmatmul.msk.bf16.vlgmr.msrb.gmra.mxu0 %vm346_vm8, %v393_v52 }
 0x379   :  { %1958 = vmatmul.msk.bf16.vlgmr.msra.gmra.mxu0 %vm171_vm0, %v2764_v57  ;;  %v551_v57 = vpack.c.bf16 %v477_v63, %v475_v1 }
 0x3e6   :  { %v407_v53 = vpop.f32.mrf.mxu0 }
 0x3ee   :  { %v409_v58 = vpop.f32.mrf.mxu0 }
 0x3ef   :  { %v414_v59 = vpack.c.bf16 %v409_v58, %v407_v53 }
 0x3f1   :  { %1916 = vmatmul.msk.bf16.vlgmr.msrb.gmra.mxu1 %vm346_vm8, %v414_v59 }
 0x3f6   :  { %v546_v60 = vpop.f32.mrf.mxu0 }
 0x3f7   :  { %v547_v3 = vadd.f32 %v2291_v0, %v546_v60 }
 0x3fe   :  { %v548_v2 = vpop.f32.mrf.mxu0 }
 0x3ff   :  { %v549_v4 = vadd.f32 %v2291_v0, %v548_v2  ;;  %v2224_v2 = vld [vmem:[#allocation7] sm:$0xff] }
 0x401   :  { %v600_v5 = vpack.c.bf16 %v549_v4, %v547_v3  ;;  %1959 = vmatmul.msk.bf16.vlgmr.msra.gmra.mxu1 %vm346_vm8, %v551_v57 }
 0x403   :  { %611 = vmatpush.bf16.msra.mxu2 %v600_v5 }
 0x46e   :  { %v433_v6 = vpop.f32.mrf.mxu1 }
 0x46f   :  { %v441_v41 = vadd.f32 %v2292_v40, %v433_v6 }
 0x476   :  { %v435_v7 = vpop.f32.mrf.mxu1 }
 0x477   :  { %v442_v46 = vadd.f32 %v2292_v40, %v435_v7  ;;  %v2226_v40 = vld [vmem:[#allocation8] sm:$0xff] }
 0x47e   :  { %v568_v8 = vpop.f32.mrf.mxu1 }
 0x47f   :  { %v573_v9 = vmul.f32 0.25, %v568_v8 }
 0x481   :  { %v575_v11 = vadd.f32 %v573_v9, %v2796_v18 }
 0x483   :  { %v577_v12 = vsel %vm346_vm8, %v575_v11, -inf }
 0x484   :  { %578 = vmax.xlane.f32.xlu2 %v577_v12 }
 0x486   :  { %v570_v13 = vpop.f32.mrf.mxu1 }
 0x487   :  { %v574_v14 = vmul.f32 0.25, %v570_v13 }
 0x489   :  { %v576_v15 = vadd.f32 %v574_v14, %v2803_v23 }
 0x48b   :  { %v580_v16 = vsel %vm346_vm8, %v576_v15, -inf }
 0x48c   :  { %581 = vmax.xlane.f32.xlu0 %v580_v16 }
 0x4f7   :  { %v579_v17 = vpop.xlane.xlu2 %578 }
 0x4f8   :  { %v583_v19 = vsub.f32 %v575_v11, %v579_v17 }
 0x4fa   :  { %v585_v20 = vmul.f32 1.442695, %v583_v19  ;;  %v2293_v19 = vld [vmem:[#allocation2 + $0x2] ss:$0 sm:$0xff] }
 0x4fc   :  { %2332 = vpow2.f32 %v585_v20 }
 0x4ff   :  { %v582_v21 = vpop.xlane.xlu0 %581 }
 0x500   :  { %v584_v22 = vsub.f32 %v576_v15, %v582_v21 }
 0x502   :  { %v2333_v24 = vpop.eup %2332  ;;  %v587_v25 = vmul.f32 1.442695, %v584_v22 }
 0x503   :  { %v589_v26 = vsel %vm346_vm8, %v2333_v24, 0.0 }
 0x504   :  { %2334 = vpow2.f32 %v587_v25  ;;  %590 = vadd.xlane.f32.xlu1 %v589_v26 }
 0x50a   :  { %v2335_v27 = vpop.eup %2334 }
 0x50b   :  { %v592_v28 = vsel %vm346_vm8, %v2335_v27, 0.0 }
 0x50c   :  { %593 = vadd.xlane.f32.xlu2 %v592_v28 }
 0x577   :  { %v591_v29 = vpop.xlane.xlu1 %590 }
 0x578   :  { %2336 = vrcp.f32 %v591_v29 }
 0x57e   :  { %v2337_v31 = vpop.eup %2336 }
 0x57f   :  { %v594_v30 = vpop.xlane.xlu2 %593  ;;  %v597_v33 = vmul.f32 %v2337_v31, %v2333_v24  ;;  %v2294_v24 = vld [vmem:[#allocation2 + $0x3] ss:$0 sm:$0xff] }
 0x580   :  { %2338 = vrcp.f32 %v594_v30  ;;  %v2233_v31 = vld [vmem:[#allocation8 + $0x38] sm:$0xff] }
 0x581   :  { %832 = vmatpush.bf16.msrb.mxu1 %v2233_v31  ;;  %v2241_v31 = vld [vmem:[%s3072_s28 + $0x70] sm:$0xff] }
 0x586   :  { %v2339_v32 = vpop.eup %2338 }
 0x587   :  { %v598_v34 = vmul.f32 %v2339_v32, %v2335_v27  ;;  %v2232_v32 = vld [vmem:[#allocation8 + $0x30] sm:$0xff] }
 0x588   :  { %833 = vmatpush.bf16.msrb.mxu1 %v2232_v32 }
 0x589   :  { %v599_v35 = vpack.c.bf16 %v598_v34, %v597_v33  ;;  %v2231_v33 = vld [vmem:[#allocation8 + $0x28] sm:$0xff]  ;;  %v2230_v34 = vld [vmem:[#allocation8 + $0x20] sm:$0xff] }
 0x58b   :  { %1960 = vmatmul.msk.bf16.vlgmr.msra.gmra.mxu2 %vm346_vm8, %v599_v35  ;;  %v2229_v35 = vld [vmem:[#allocation8 + $0x18] sm:$0xff] }
 0x58c   :  { %834 = vmatpush.bf16.msrb.mxu1 %v2231_v33 }
 0x590   :  { %835 = vmatpush.bf16.msrb.mxu1 %v2230_v34 }
 0x594   :  { %836 = vmatpush.bf16.msrb.mxu1 %v2229_v35 }
 0x598   :  { %837 = vmatpush.bf16.msrb.mxu1 %v2228_v36 }
 0x60e   :  { %v613_v37 = vpop.f32.mrf.mxu2 }
 0x616   :  { %v615_v38 = vpop.f32.mrf.mxu2 }
 0x617   :  { %v621_v39 = vpack.c.bf16 %v615_v38, %v613_v37  ;;  %v2227_v37 = vld [vmem:[#allocation8 + $0x8] sm:$0xff]  ;;  %v2295_v38 = vld [vmem:[%s3044_s8] ss:$0 sm:$0xff] }
 0x618   :  { %838 = vmatpush.bf16.msrb.mxu1 %v2227_v37 }
 0x619   :  { %1965 = vmatmul.msk.bf16.vlgmr.msra.gmra.mxu3 %vm346_vm8, %v621_v39 }
 0x61c   :  { %839 = vmatpush.bf16.msrb.mxu1 %v2226_v40 }
 0x69c   :  { %v640_v42 = vpop.f32.mrf.mxu3 }
 0x69d   :  { %v645_v43 = vadd.f32 %v640_v42, %v441_v41 }
 0x69f   :  { %v647_v44 = vadd.f32 %v645_v43, %v2758_v55 }
 0x6a1   :  { %v653_v45 = vsel %vm171_vm0, %v647_v44, 0.0 }
 0x6a2   :  { %654 = vadd.xlane.f32.xlu0 %v653_v45 }
 0x6a4   :  { %v642_v47 = vpop.f32.mrf.mxu3 }
 0x6a5   :  { %v646_v48 = vadd.f32 %v642_v47, %v442_v46 }
 0x6a7   :  { %v648_v49 = vadd.f32 %v646_v48, %v2760_v56  ;;  %v2225_v56 = vld [vmem:[#allocation7 + $0x8] sm:$0xff] }
 0x6a8   :  { %737 = vmatpush.bf16.msrb.mxu0 %v2225_v56 }
 0x6a9   :  { %v656_v50 = vsel %vm171_vm0, %v648_v49, 0.0 }
 0x6aa   :  { %657 = vadd.xlane.f32.xlu1 %v656_v50 }
 0x6ac   :  { %738 = vmatpush.bf16.msrb.mxu0 %v2224_v2 }
 0x715   :  { %v655_v51 = vpop.xlane.xlu0 %654 }
 0x716   :  { %v659_v52 = vmul.f32 %v655_v51, %v2726_v10 }
 0x718   :  { %v661_v53 = vsub.f32 %v647_v44, %v659_v52 }
 0x71a   :  { %v663_v54 = vmul.f32 %v661_v53, %v661_v53 }
 0x71c   :  { %v665_v58 = vsel %vm171_vm0, %v663_v54, 0.0 }
 0x71d   :  { %666 = vadd.xlane.f32.xlu2 %v665_v58  ;;  %v658_v55 = vpop.xlane.xlu1 %657 }
 0x71e   :  { %v660_v59 = vmul.f32 %v658_v55, %v2726_v10 }
 0x720   :  { %v662_v60 = vsub.f32 %v648_v49, %v660_v59 }
 0x722   :  { %v664_v61 = vmul.f32 %v662_v60, %v662_v60 }
 0x724   :  { %v668_v62 = vsel %vm171_vm0, %v664_v61, 0.0 }
 0x725   :  { %669 = vadd.xlane.f32.xlu0 %v668_v62 }
 0x790   :  { %v667_v63 = vpop.xlane.xlu2 %666 }
 0x791   :  { %v671_v0 = vmul.f32 %v667_v63, %v2726_v10 }
 0x793   :  { %v673_v1 = vadd.f32 1e-12, %v671_v0  ;;  %v2296_v0 = vld [vmem:[%s3046_s10] ss:$0 sm:$0xff] }
 0x795   :  { %2340 = vrsqrt.f32 %v673_v1  ;;  %vm681_vm10 = vweird.f32 %v673_v1 }
 0x798   :  { %v670_v57 = vpop.xlane.xlu0 %669 }
 0x799   :  { %v672_v3 = vmul.f32 %v670_v57, %v2726_v10 }
 0x79b   :  { %v2341_v4 = vpop.eup %2340  ;;  %v674_v5 = vadd.f32 1e-12, %v672_v3 }
 0x79c   :  { %v676_v6 = vmul.f32 %v2341_v4, %v673_v1  ;;  %vm682_vm9 = vweird.f32 %v2341_v4 }
 0x79d   :  { %2342 = vrsqrt.f32 %v674_v5  ;;  %vm683_vm11 = vmor %vm681_vm10, %vm682_vm9  ;;  %vm691_vm13 = vweird.f32 %v674_v5 }
 0x79e   :  { %v677_v7 = vmul.f32 %v2341_v4, %v676_v6 }
 0x7a0   :  { %v678_v8 = vmul.f32 0.5, %v677_v7 }
 0x7a2   :  { %v679_v9 = vsub.f32 1.5, %v678_v8 }
 0x7a3   :  { %v2343_v11 = vpop.eup %2342 }
 0x7a4   :  { %v680_v12 = vmul.f32 %v2341_v4, %v679_v9  ;;  %v686_v13 = vmul.f32 %v2343_v11, %v674_v5  ;;  %vm692_vm12 = vweird.f32 %v2343_v11 }
 0x7a5   :  { %vm693_vm14 = vmor %vm691_vm13, %vm692_vm12 }
 0x7a6   :  { %v687_v14 = vmul.f32 %v2343_v11, %v686_v13  ;;  %v684_v15 = vsel %vm683_vm11, %v2341_v4, %v680_v12 }
 0x7a7   :  { %v695_v20 = vmul.f32 %v684_v15, %v661_v53 }
 0x7a8   :  { %v688_v16 = vmul.f32 0.5, %v687_v14 }
 0x7a9   :  { %v700_v25 = vmul.f32 %v2293_v19, %v695_v20  ;;  %v2235_v20 = vld [vmem:[%s3072_s28 + $0x68] sm:$0xff] }
 0x7aa   :  { %v689_v17 = vsub.f32 1.5, %v688_v16  ;;  %940 = vmatpush.bf16.msrb.mxu2 %v2235_v20 }
 0x7ab   :  { %v705_v28 = vadd.f32 %v2294_v24, %v700_v25  ;;  %v2242_v25 = vld [vmem:[%s3072_s28 + $0x78] sm:$0xff] }
 0x7ac   :  { %v690_v21 = vmul.f32 %v2343_v11, %v689_v17  ;;  %1147 = vmatpush.bf16.msra.mxu1 %v2242_v25 }
 0x7ae   :  { %v694_v22 = vsel %vm693_vm14, %v2343_v11, %v690_v21  ;;  %v2237_v21 = vld [vmem:[%s3072_s28 + $0x88] sm:$0xff] }
 0x7af   :  { %v696_v26 = vmul.f32 %v694_v22, %v662_v60  ;;  %v2239_v22 = vld [vmem:[%s3072_s28 + $0xa8] sm:$0xff]  ;;  %976 = vmatpush.bf16.msrb.mxu3 %v2237_v21 }
 0x7b0   :  { %1012 = vmatpush.bf16.msra.mxu0 %v2239_v22  ;;  %1148 = vmatpush.bf16.msra.mxu1 %v2241_v31 }
 0x7b1   :  { %v701_v27 = vmul.f32 %v2293_v19, %v696_v26 }
 0x7b3   :  { %v706_v29 = vadd.f32 %v2294_v24, %v701_v27 }
 0x7b5   :  { %v711_v30 = vpack.c.bf16 %v706_v29, %v705_v28 }
 0x7b7   :  { %1974 = vmatmul.msk.bf16.vlgmr.msrb.gmra.mxu0 %vm171_vm0, %v711_v30  ;;  %v2238_v30 = vld [vmem:[%s3072_s28 + $0xa0] sm:$0xff] }
 0x7b8   :  { %1013 = vmatpush.bf16.msra.mxu0 %v2238_v30 }
 0x834   :  { %v740_v39 = vpop.f32.mrf.mxu0 }
 0x835   :  { %v741_v41 = vadd.f32 %v2295_v38, %v740_v39 }
 0x837   :  { %v745_v42 = vmul.f32 %v741_v41, %v741_v41 }
 0x839   :  { %v747_v43 = vmul.f32 %v745_v42, %v741_v41 }
 0x83b   :  { %v749_v44 = vmul.f32 0.044715, %v747_v43 }
 0x83c   :  { %v742_v45 = vpop.f32.mrf.mxu0 }
 0x83d   :  { %v751_v46 = vadd.f32 %v749_v44, %v741_v41  ;;  %v743_v47 = vadd.f32 %v2295_v38, %v742_v45 }
 0x83f   :  { %v753_v48 = vmul.f32 0.7978846, %v751_v46  ;;  %v746_v49 = vmul.f32 %v743_v47, %v743_v47 }
 0x841   :  { %v748_v50 = vmul.f32 %v746_v49, %v743_v47  ;;  %2344 = vtanh.f32 %v753_v48 }
 0x843   :  { %v750_v51 = vmul.f32 0.044715, %v748_v50 }
 0x845   :  { %v752_v52 = vadd.f32 %v750_v51, %v743_v47  ;;  %v2298_v51 = vld [vmem:[#allocation2 + $0x5] ss:$0 sm:$0xff] }
 0x847   :  { %v754_v53 = vmul.f32 0.7978846, %v752_v52  ;;  %v2345_v54 = vpop.eup %2344 }
 0x848   :  { %v757_v58 = vadd.f32 1.0, %v2345_v54 }
 0x849   :  { %2346 = vtanh.f32 %v754_v53 }
 0x84a   :  { %v759_v59 = vmul.f32 0.5, %v757_v58 }
 0x84c   :  { %v761_v62 = vmul.f32 %v759_v59, %v741_v41 }
 0x84f   :  { %v2347_v55 = vpop.eup %2346 }
 0x850   :  { %v758_v60 = vadd.f32 1.0, %v2347_v55 }
 0x852   :  { %v760_v61 = vmul.f32 0.5, %v758_v60 }
 0x854   :  { %v762_v56 = vmul.f32 %v760_v61, %v743_v47  ;;  %v2297_v47 = vld [vmem:[#allocation2 + $0x4] ss:$0 sm:$0xff]  ;;  %v2299_v61 = vld [vmem:[%s3073_s27 + $0xa] ss:$0 sm:$0xff] }
 0x856   :  { %v779_v63 = vpack.c.bf16 %v762_v56, %v761_v62 }
 0x858   :  { %840 = vmatmul.bf16.vlgmr.msrb.gmra.mxu1 %v779_v63 }
 0x8d5   :  { %v841_v1 = vpop.f32.mrf.mxu1 }
 0x8d6   :  { %v842_v2 = vadd.f32 %v2296_v0, %v841_v1 }
 0x8d8   :  { %v846_v57 = vadd.f32 %v842_v2, %v705_v28  ;;  %v2234_v28 = vld [vmem:[%s3072_s28 + $0x60] sm:$0xff]  ;;  %v2302_v2 = vld [vmem:[%s3073_s27 + $0x8] ss:$0 sm:$0xff] }
 0x8d9   :  { %941 = vmatpush.bf16.msrb.mxu2 %v2234_v28  ;;  %v2303_v28 = vld [vmem:[%s3073_s27 + $0x9] ss:$0 sm:$0xff] }
 0x8da   :  { %v852_v3 = vsel %vm171_vm0, %v846_v57, 0.0 }
 0x8db   :  { %853 = vadd.xlane.f32.xlu1 %v852_v3 }
 0x8dd   :  { %v843_v4 = vpop.f32.mrf.mxu1 }
 0x8de   :  { %v844_v5 = vadd.f32 %v2296_v0, %v843_v4 }
 0x8e0   :  { %v847_v6 = vadd.f32 %v844_v5, %v706_v29  ;;  %v2236_v29 = vld [vmem:[%s3072_s28 + $0x80] sm:$0xff] }
 0x8e1   :  { %977 = vmatpush.bf16.msrb.mxu3 %v2236_v29 }
 0x8e2   :  { %v855_v7 = vsel %vm171_vm0, %v847_v6, 0.0 }
 0x8e3   :  { %856 = vadd.xlane.f32.xlu2 %v855_v7  ;;  %v2244_v7 = vld [vmem:[%s3072_s28 + $0x98] sm:$0xff] }
 0x94e   :  { %v854_v8 = vpop.xlane.xlu1 %853 }
 0x94f   :  { %v858_v9 = vmul.f32 %v854_v8, %v2726_v10 }
 0x951   :  { %v860_v11 = vsub.f32 %v846_v57, %v858_v9  ;;  %v2301_v9 = vld [vmem:[%s3073_s27 + $0x6] ss:$0 sm:$0xff] }
 0x953   :  { %v862_v12 = vmul.f32 %v860_v11, %v860_v11 }
 0x955   :  { %v864_v13 = vsel %vm171_vm0, %v862_v12, 0.0 }
 0x956   :  { %v857_v14 = vpop.xlane.xlu2 %856  ;;  %865 = vadd.xlane.f32.xlu0 %v864_v13  ;;  %v2243_v13 = vld [vmem:[%s3072_s28 + $0x90] sm:$0xff] }
 0x957   :  { %v859_v15 = vmul.f32 %v857_v14, %v2726_v10 }
 0x959   :  { %v861_v16 = vsub.f32 %v847_v6, %v859_v15 }
 0x95b   :  { %v863_v17 = vmul.f32 %v861_v16, %v861_v16 }
 0x95d   :  { %v867_v19 = vsel %vm171_vm0, %v863_v17, 0.0 }
 0x95e   :  { %868 = vadd.xlane.f32.xlu1 %v867_v19 }
 0x9c9   :  { %v866_v24 = vpop.xlane.xlu0 %865 }
 0x9ca   :  { %v870_v26 = vmul.f32 %v866_v24, %v2726_v10 }
 0x9cc   :  { %v872_v27 = vadd.f32 1e-12, %v870_v26 }
 0x9ce   :  { %2348 = vrsqrt.f32 %v872_v27  ;;  %vm880_vm1 = vweird.f32 %v872_v27 }
 0x9d1   :  { %v869_v32 = vpop.xlane.xlu1 %868 }
 0x9d2   :  { %v871_v33 = vmul.f32 %v869_v32, %v2726_v10 }
 0x9d4   :  { %v2349_v34 = vpop.eup %2348  ;;  %v873_v35 = vadd.f32 1e-12, %v871_v33 }
 0x9d5   :  { %v875_v36 = vmul.f32 %v2349_v34, %v872_v27  ;;  %vm881_vm15 = vweird.f32 %v2349_v34 }
 0x9d6   :  { %2350 = vrsqrt.f32 %v873_v35  ;;  %vm882_vm2 = vmor %vm880_vm1, %vm881_vm15  ;;  %vm890_vm4 = vweird.f32 %v873_v35 }
 0x9d7   :  { %v876_v37 = vmul.f32 %v2349_v34, %v875_v36 }
 0x9d9   :  { %v877_v38 = vmul.f32 0.5, %v876_v37 }
 0x9db   :  { %v878_v39 = vsub.f32 1.5, %v877_v38 }
 0x9dc   :  { %v2351_v40 = vpop.eup %2350 }
 0x9dd   :  { %v879_v41 = vmul.f32 %v2349_v34, %v878_v39  ;;  %v885_v42 = vmul.f32 %v2351_v40, %v873_v35  ;;  %vm891_vm3 = vweird.f32 %v2351_v40 }
 0x9de   :  { %vm892_vm5 = vmor %vm890_vm4, %vm891_vm3 }
 0x9df   :  { %v886_v43 = vmul.f32 %v2351_v40, %v885_v42  ;;  %v883_v44 = vsel %vm882_vm2, %v2349_v34, %v879_v41 }
 0x9e0   :  { %v894_v48 = vmul.f32 %v883_v44, %v860_v11  ;;  %v2246_v44 = vld [vmem:[%s3072_s28 + $0xb8] sm:$0xff] }
 0x9e1   :  { %v887_v45 = vmul.f32 0.5, %v886_v43 }
 0x9e2   :  { %v899_v52 = vmul.f32 %v2297_v47, %v894_v48 }
 0x9e3   :  { %v888_v46 = vsub.f32 1.5, %v887_v45  ;;  %v2245_v45 = vld [vmem:[%s3072_s28 + $0xb0] sm:$0xff] }
 0x9e4   :  { %v2890_v58 = vadd.f32 %v2298_v51, %v899_v52 }
 0x9e5   :  { %v889_v49 = vmul.f32 %v2351_v40, %v888_v46 }
 0x9e7   :  { %v893_v50 = vsel %vm892_vm5, %v2351_v40, %v889_v49  ;;  %vm1769_vm5 = vcmask 523264  }
 0x9e8   :  { %v895_v53 = vmul.f32 %v893_v50, %v861_v16  ;;  %v2240_v16 = vld [vmem:[#allocation5 + $0x10] sm:$0xff] }
 0x9e9   :  { %1107 = vmatpush.bf16.msrb.mxu0 %v2240_v16 }
 0x9ea   :  { %v900_v54 = vmul.f32 %v2297_v47, %v895_v53 }
 0x9ec   :  { %v2892_v55 = vadd.f32 %v2298_v51, %v900_v54 }
 0x9ee   :  { %v2896_v59 = vpack.c.bf16 %v2892_v55, %v2890_v58 }
 0x9f0   :  { %2021 = vmatmul.msk.bf16.vlgmr.msrb.gmra.mxu2 %vm171_vm0, %v2896_v59  ;;  %2035 = vmatmul.msk.bf16.vlgmr.msrb.gmra.mxu3 %vm171_vm0, %v2896_v59 }
 0x9f1   :  { %2049 = vmatmul.msk.bf16.vlgmr.msra.gmra.mxu0 %vm171_vm0, %v2896_v59  ;;  %2070 = vmatmul.msk.bf16.vlgmr.msra.gmra.mxu1 %vm171_vm0, %v2896_v59 }
 0xa6e   :  { %v1015_v60 = vpop.f32.mrf.mxu0  ;;  %v1150_v54 = vpop.f32.mrf.mxu1 }
 0xa6f   :  { %v1016_v0 = vadd.f32 %v2299_v61, %v1015_v60 }
 0xa73   :  { %v979_v62 = vpop.f32.mrf.mxu3  ;;  %v943_v56 = vpop.f32.mrf.mxu2 }
 0xa74   :  { %v980_v4 = vadd.f32 %v2302_v2, %v979_v62  ;;  %v944_v14 = vadd.f32 %v2301_v9, %v943_v56 }
 0xa76   :  { %v1017_v63 = vpop.f32.mrf.mxu0  ;;  %v1152_v56 = vpop.f32.mrf.mxu1 }
 0xa77   :  { %v1018_v1 = vadd.f32 %v2299_v61, %v1017_v63  ;;  %v2300_v63 = vld [vmem:[%s3073_s27 + $0x7] ss:$0 sm:$0xff] }
 0xa79   :  { %v1069_v57 = vpack.c.bf16 %v1018_v1, %v1016_v0  ;;  %v1153_v0 = vadd.f32 %v2300_v63, %v1152_v56  ;;  %v2304_v1 = vld [vmem:[%s3073_s27 + $0xb] ss:$0 sm:$0xff] }
 0xa7b   :  { %1080 = vmatpush.bf16.msra.mxu3 %v1069_v57  ;;  %v981_v3 = vpop.f32.mrf.mxu3  ;;  %v945_v8 = vpop.f32.mrf.mxu2 }
 0xa7c   :  { %v982_v5 = vadd.f32 %v2302_v2, %v981_v3  ;;  %v946_v12 = vadd.f32 %v2301_v9, %v945_v8  ;;  %v1151_v2 = vadd.f32 %v2300_v63, %v1150_v54 }
 0xa7e   :  { %v1021_v6 = vpack.c.bf16 %v982_v5, %v980_v4  ;;  %v1020_v15 = vpack.c.bf16 %v946_v12, %v944_v14 }
 0xa7f   :  { %1219 = vmatpush.bf16.msrb.mxu3 %v2246_v44 }
 0xa80   :  { %v1026_v11 = vsel %vm346_vm8, %v1021_v6, 0 }
 0xa81   :  { %1035 = vmatpush.bf16.xpose.msra.mxu2 %v1026_v11 }
 0xa83   :  { %1220 = vmatpush.bf16.msrb.mxu3 %v2245_v45 }
 0xa88   :  { %2050 = vmatmul.msk.bf16.vlgmr.msra.gmra.mxu2 %vm346_vm8, %v1020_v15 }
 0xa89   :  { %1183 = vmatpush.bf16.msrb.mxu2 %v2244_v7 }
 0xa8d   :  { %1184 = vmatpush.bf16.msrb.mxu2 %v2243_v13 }
 0xa98   :  { %2084 = vmatmul.msk.bf16.vlgmr.msrb.gmra.mxu2 %vm171_vm0, %v2896_v59 }
 0xb0b   :  { %v1037_v17 = vpop.f32.mrf.mxu2 }
 0xb0c   :  { %v1042_v19 = vmul.f32 0.25, %v1037_v17 }
 0xb0e   :  { %v1044_v20 = vadd.f32 %v1042_v19, %v2796_v18 }
 0xb10   :  { %v1046_v21 = vsel %vm346_vm8, %v1044_v20, -inf }
 0xb11   :  { %1047 = vmax.xlane.f32.xlu2 %v1046_v21 }
 0xb13   :  { %v1039_v22 = vpop.f32.mrf.mxu2 }
 0xb14   :  { %v1043_v24 = vmul.f32 0.25, %v1039_v22 }
 0xb16   :  { %v1045_v25 = vadd.f32 %v1043_v24, %v2803_v23 }
 0xb18   :  { %v1049_v26 = vsel %vm346_vm8, %v1045_v25, -inf }
 0xb19   :  { %1050 = vmax.xlane.f32.xlu0 %v1049_v26 }
 0xb1b   :  { %v1186_v27 = vpop.f32.mrf.mxu2 }
 0xb1c   :  { %v1187_v30 = vadd.f32 %v2303_v28, %v1186_v27 }
 0xb23   :  { %v1188_v29 = vpop.f32.mrf.mxu2 }
 0xb24   :  { %v1189_v31 = vadd.f32 %v2303_v28, %v1188_v29 }
 0xb26   :  { %v1228_v32 = vpack.c.bf16 %v1189_v31, %v1187_v30 }
 0xb28   :  { %v1233_v33 = vsel %vm346_vm8, %v1228_v32, 0 }
 0xb29   :  { %1242 = vmatpush.bf16.xpose.msra.mxu0 %v1233_v33 }
 0xb84   :  { %v1048_v34 = vpop.xlane.xlu2 %1047 }
 0xb85   :  { %v1052_v35 = vsub.f32 %v1044_v20, %v1048_v34  ;;  %v2247_v34 = vld [vmem:[#allocation5 + $0x18] sm:$0xff] }
 0xb86   :  { %1314 = vmatpush.bf16.msra.mxu2 %v2247_v34  ;;  %v2308_v34 = vld [vmem:[%s3044_s8 + $0x1] ss:$0 sm:$0xff] }
 0xb87   :  { %v1054_v36 = vmul.f32 1.442695, %v1052_v35 }
 0xb89   :  { %2352 = vpow2.f32 %v1054_v36 }
 0xb8c   :  { %v1051_v37 = vpop.xlane.xlu0 %1050 }
 0xb8d   :  { %v1053_v38 = vsub.f32 %v1045_v25, %v1051_v37 }
 0xb8f   :  { %v2353_v39 = vpop.eup %2352  ;;  %v1056_v40 = vmul.f32 1.442695, %v1053_v38  ;;  %v2305_v38 = vld [vmem:[%s3042_s6 + $0x1] ss:$0 sm:$0xff] }
 0xb90   :  { %v1058_v41 = vsel %vm346_vm8, %v2353_v39, 0.0 }
 0xb91   :  { %2354 = vpow2.f32 %v1056_v40  ;;  %1059 = vadd.xlane.f32.xlu1 %v1058_v41 }
 0xb97   :  { %v2355_v42 = vpop.eup %2354 }
 0xb98   :  { %v1061_v43 = vsel %vm346_vm8, %v2355_v42, 0.0 }
 0xb99   :  { %1062 = vadd.xlane.f32.xlu2 %v1061_v43 }
 0xc04   :  { %v1060_v46 = vpop.xlane.xlu1 %1059 }
 0xc05   :  { %2356 = vrcp.f32 %v1060_v46 }
 0xc0b   :  { %v2357_v48 = vpop.eup %2356 }
 0xc0c   :  { %v1063_v47 = vpop.xlane.xlu2 %1062  ;;  %v1066_v50 = vmul.f32 %v2357_v48, %v2353_v39 }
 0xc0d   :  { %2358 = vrcp.f32 %v1063_v47 }
 0xc13   :  { %v2359_v49 = vpop.eup %2358 }
 0xc14   :  { %v1067_v51 = vmul.f32 %v2359_v49, %v2355_v42 }
 0xc16   :  { %v1068_v52 = vpack.c.bf16 %v1067_v51, %v1066_v50 }
 0xc18   :  { %2051 = vmatmul.msk.bf16.vlgmr.msra.gmra.mxu3 %vm346_vm8, %v1068_v52 }
 0xc28   :  { %2098 = vmatmul.msk.bf16.vlgmr.msrb.gmra.mxu3 %vm171_vm0, %v2896_v59  ;;  %v1227_v59 = vpack.c.bf16 %v1153_v0, %v1151_v2 }
 0xc9b   :  { %v1082_v53 = vpop.f32.mrf.mxu3 }
 0xca3   :  { %v1084_v60 = vpop.f32.mrf.mxu3 }
 0xca4   :  { %v1090_v61 = vpack.c.bf16 %v1084_v60, %v1082_v53 }
 0xca6   :  { %2056 = vmatmul.msk.bf16.vlgmr.msrb.gmra.mxu0 %vm346_vm8, %v1090_v61 }
 0xcab   :  { %v1222_v62 = vpop.f32.mrf.mxu3 }
 0xcac   :  { %v1223_v3 = vadd.f32 %v2304_v1, %v1222_v62 }
 0xcb3   :  { %v1224_v57 = vpop.f32.mrf.mxu3 }
 0xcb4   :  { %v1225_v4 = vadd.f32 %v2304_v1, %v1224_v57  ;;  %v2248_v1 = vld [vmem:[#allocation7 + $0x10] sm:$0xff] }
 0xcb6   :  { %v1276_v5 = vpack.c.bf16 %v1225_v4, %v1223_v3  ;;  %2099 = vmatmul.msk.bf16.vlgmr.msra.gmra.mxu0 %vm346_vm8, %v1227_v59 }
 0xcb8   :  { %1287 = vmatpush.bf16.msrb.mxu1 %v1276_v5 }
 0xd23   :  { %v1109_v6 = vpop.f32.mrf.mxu0 }
 0xd24   :  { %v1117_v39 = vadd.f32 %v2305_v38, %v1109_v6 }
 0xd2b   :  { %v1111_v7 = vpop.f32.mrf.mxu0 }
 0xd2c   :  { %v1118_v44 = vadd.f32 %v2305_v38, %v1111_v7 }
 0xd33   :  { %v1244_v8 = vpop.f32.mrf.mxu0 }
 0xd34   :  { %v1249_v9 = vmul.f32 0.25, %v1244_v8 }
 0xd36   :  { %v1251_v11 = vadd.f32 %v1249_v9, %v2796_v18 }
 0xd38   :  { %v1253_v12 = vsel %vm346_vm8, %v1251_v11, -inf }
 0xd39   :  { %1254 = vmax.xlane.f32.xlu0 %v1253_v12 }
 0xd3b   :  { %v1246_v13 = vpop.f32.mrf.mxu0 }
 0xd3c   :  { %v1250_v14 = vmul.f32 0.25, %v1246_v13 }
 0xd3e   :  { %v1252_v15 = vadd.f32 %v1250_v14, %v2803_v23 }
 0xd40   :  { %v1256_v16 = vsel %vm346_vm8, %v1252_v15, -inf }
 0xd41   :  { %1257 = vmax.xlane.f32.xlu1 %v1256_v16  ;;  %v2306_v16 = vld [vmem:[#allocation2 + $0x6] ss:$0 sm:$0xff] }
 0xdac   :  { %v1255_v17 = vpop.xlane.xlu0 %1254 }
 0xdad   :  { %v1259_v19 = vsub.f32 %v1251_v11, %v1255_v17 }
 0xdaf   :  { %v1261_v20 = vmul.f32 1.442695, %v1259_v19 }
 0xdb1   :  { %2360 = vpow2.f32 %v1261_v20 }
 0xdb4   :  { %v1258_v21 = vpop.xlane.xlu1 %1257 }
 0xdb5   :  { %v1260_v22 = vsub.f32 %v1252_v15, %v1258_v21  ;;  %v2307_v21 = vld [vmem:[#allocation2 + $0x7] ss:$0 sm:$0xff] }
 0xdb7   :  { %v2361_v24 = vpop.eup %2360  ;;  %v1263_v25 = vmul.f32 1.442695, %v1260_v22 }
 0xdb8   :  { %v1265_v18 = vsel %vm346_vm8, %v2361_v24, 0.0 }
 0xdb9   :  { %2362 = vpow2.f32 %v1263_v25  ;;  %1266 = vadd.xlane.f32.xlu2 %v1265_v18 }
 0xdbf   :  { %v2363_v26 = vpop.eup %2362 }
 0xdc0   :  { %v1268_v27 = vsel %vm346_vm8, %v2363_v26, 0.0 }
 0xdc1   :  { %1269 = vadd.xlane.f32.xlu0 %v1268_v27 }
 0xe2c   :  { %v1267_v23 = vpop.xlane.xlu2 %1266 }
 0xe2d   :  { %2364 = vrcp.f32 %v1267_v23  ;;  %v2257_v23 = vld [vmem:[#allocation8 + $0x78] sm:$0xff] }
 0xe2e   :  { %1512 = vmatpush.bf16.msrb.mxu0 %v2257_v23 }
 0xe33   :  { %v2365_v29 = vpop.eup %2364 }
 0xe34   :  { %v1270_v28 = vpop.xlane.xlu0 %1269  ;;  %v1273_v31 = vmul.f32 %v2365_v29, %v2361_v24  ;;  %v2255_v29 = vld [vmem:[#allocation8 + $0x68] sm:$0xff] }
 0xe35   :  { %2366 = vrcp.f32 %v1270_v28  ;;  %v2256_v28 = vld [vmem:[#allocation8 + $0x70] sm:$0xff] }
 0xe36   :  { %1513 = vmatpush.bf16.msrb.mxu0 %v2256_v28 }
 0xe3a   :  { %1514 = vmatpush.bf16.msrb.mxu0 %v2255_v29 }
 0xe3b   :  { %v2367_v30 = vpop.eup %2366 }
 0xe3c   :  { %v1274_v32 = vmul.f32 %v2367_v30, %v2363_v26  ;;  %v2254_v30 = vld [vmem:[#allocation8 + $0x60] sm:$0xff] }
 0xe3e   :  { %v1275_v33 = vpack.c.bf16 %v1274_v32, %v1273_v31  ;;  %1515 = vmatpush.bf16.msrb.mxu0 %v2254_v30  ;;  %v2253_v31 = vld [vmem:[#allocation8 + $0x58] sm:$0xff]  ;;  %v2252_v32 = vld [vmem:[#allocation8 + $0x50] sm:$0xff] }
 0xe40   :  { %2100 = vmatmul.msk.bf16.vlgmr.msrb.gmra.mxu1 %vm346_vm8, %v1275_v33  ;;  %v2251_v33 = vld [vmem:[#allocation8 + $0x48] sm:$0xff] }
 0xe42   :  { %1516 = vmatpush.bf16.msrb.mxu0 %v2253_v31  ;;  %v1586_v31 = vlaneseq }
 0xe46   :  { %1517 = vmatpush.bf16.msrb.mxu0 %v2252_v32 }
 0xe4a   :  { %1518 = vmatpush.bf16.msrb.mxu0 %v2251_v33 }
 0xebd   :  { %v1289_v35 = vpop.f32.mrf.mxu1 }
 0xec5   :  { %v1291_v36 = vpop.f32.mrf.mxu1 }
 0xec6   :  { %v1297_v37 = vpack.c.bf16 %v1291_v36, %v1289_v35  ;;  %v2250_v36 = vld [vmem:[#allocation8 + $0x40] sm:$0xff] }
 0xec7   :  { %1519 = vmatpush.bf16.msrb.mxu0 %v2250_v36  ;;  %v2310_v36 = vld [vmem:[#allocation2 + $0x8] ss:$0 sm:$0xff] }
 0xec8   :  { %2105 = vmatmul.msk.bf16.vlgmr.msra.gmra.mxu2 %vm346_vm8, %v1297_v37 }
 0xf4b   :  { %v1316_v40 = vpop.f32.mrf.mxu2 }
 0xf4c   :  { %v1321_v41 = vadd.f32 %v1316_v40, %v1117_v39 }
 0xf4e   :  { %v1323_v42 = vadd.f32 %v1321_v41, %v2890_v58 }
 0xf50   :  { %v1329_v43 = vsel %vm171_vm0, %v1323_v42, 0.0 }
 0xf51   :  { %1330 = vadd.xlane.f32.xlu1 %v1329_v43 }
 0xf53   :  { %v1318_v45 = vpop.f32.mrf.mxu2 }
 0xf54   :  { %v1322_v46 = vadd.f32 %v1318_v45, %v1118_v44 }
 0xf56   :  { %v1324_v47 = vadd.f32 %v1322_v46, %v2892_v55  ;;  %v2249_v55 = vld [vmem:[#allocation7 + $0x18] sm:$0xff] }
 0xf57   :  { %1415 = vmatpush.bf16.msra.mxu3 %v2249_v55  ;;  %v2309_v55 = vld [vmem:[%s3046_s10 + $0x1] ss:$0 sm:$0xff] }
 0xf58   :  { %v1332_v48 = vsel %vm171_vm0, %v1324_v47, 0.0 }
 0xf59   :  { %1333 = vadd.xlane.f32.xlu2 %v1332_v48 }
 0xf5b   :  { %1416 = vmatpush.bf16.msra.mxu3 %v2248_v1 }
 0xfc4   :  { %v1331_v49 = vpop.xlane.xlu1 %1330 }
 0xfc5   :  { %v1335_v50 = vmul.f32 %v1331_v49, %v2726_v10 }
 0xfc7   :  { %v1337_v51 = vsub.f32 %v1323_v42, %v1335_v50 }
 0xfc9   :  { %v1339_v52 = vmul.f32 %v1337_v51, %v1337_v51 }
 0xfcb   :  { %v1341_v53 = vsel %vm171_vm0, %v1339_v52, 0.0 }
 0xfcc   :  { %1342 = vadd.xlane.f32.xlu0 %v1341_v53  ;;  %v1334_v58 = vpop.xlane.xlu2 %1333 }
 0xfcd   :  { %v1336_v54 = vmul.f32 %v1334_v58, %v2726_v10 }
 0xfcf   :  { %v1338_v60 = vsub.f32 %v1324_v47, %v1336_v54 }
 0xfd1   :  { %v1340_v61 = vmul.f32 %v1338_v60, %v1338_v60 }
 0xfd3   :  { %v1344_v62 = vsel %vm171_vm0, %v1340_v61, 0.0 }
 0xfd4   :  { %1345 = vadd.xlane.f32.xlu1 %v1344_v62 }
0x103f   :  { %v1343_v56 = vpop.xlane.xlu0 %1342 }
0x1040   :  { %v1347_v63 = vmul.f32 %v1343_v56, %v2726_v10 }
0x1042   :  { %v1349_v0 = vadd.f32 1e-12, %v1347_v63 }
0x1044   :  { %2368 = vrsqrt.f32 %v1349_v0  ;;  %vm1357_vm7 = vweird.f32 %v1349_v0 }
0x1047   :  { %v1346_v2 = vpop.xlane.xlu1 %1345 }
0x1048   :  { %v1348_v57 = vmul.f32 %v1346_v2, %v2726_v10 }
0x104a   :  { %v2369_v59 = vpop.eup %2368  ;;  %v1350_v3 = vadd.f32 1e-12, %v1348_v57 }
0x104b   :  { %v1352_v4 = vmul.f32 %v2369_v59, %v1349_v0  ;;  %vm1358_vm6 = vweird.f32 %v2369_v59 }
0x104c   :  { %2370 = vrsqrt.f32 %v1350_v3  ;;  %vm1359_vm9 = vmor %vm1357_vm7, %vm1358_vm6  ;;  %vm1367_vm11 = vweird.f32 %v1350_v3 }
0x104d   :  { %v1353_v5 = vmul.f32 %v2369_v59, %v1352_v4 }
0x104f   :  { %v1354_v6 = vmul.f32 0.5, %v1353_v5 }
0x1051   :  { %v1355_v7 = vsub.f32 1.5, %v1354_v6 }
0x1052   :  { %v2371_v8 = vpop.eup %2370 }
0x1053   :  { %v1356_v9 = vmul.f32 %v2369_v59, %v1355_v7  ;;  %v1362_v11 = vmul.f32 %v2371_v8, %v1350_v3  ;;  %vm1368_vm10 = vweird.f32 %v2371_v8 }
0x1054   :  { %vm1369_vm12 = vmor %vm1367_vm11, %vm1368_vm10 }
0x1055   :  { %v1363_v12 = vmul.f32 %v2371_v8, %v1362_v11  ;;  %v1360_v13 = vsel %vm1359_vm9, %v2369_v59, %v1356_v9 }
0x1056   :  { %v1371_v17 = vmul.f32 %v1360_v13, %v1337_v51 }
0x1057   :  { %v1364_v14 = vmul.f32 0.5, %v1363_v12 }
0x1058   :  { %v1376_v22 = vmul.f32 %v2306_v16, %v1371_v17 }
0x1059   :  { %v1365_v15 = vsub.f32 1.5, %v1364_v14 }
0x105a   :  { %v1381_v18 = vadd.f32 %v2307_v21, %v1376_v22 }
0x105b   :  { %v1366_v19 = vmul.f32 %v2371_v8, %v1365_v15 }
0x105d   :  { %v1370_v20 = vsel %vm1369_vm12, %v2371_v8, %v1366_v19 }
0x105e   :  { %v1372_v24 = vmul.f32 %v1370_v20, %v1338_v60  ;;  %v2259_v20 = vld [vmem:[#allocation10 + $0x8] sm:$0xff] }
0x105f   :  { %1647 = vmatpush.bf16.msrb.mxu2 %v2259_v20 }
0x1060   :  { %v1377_v25 = vmul.f32 %v2306_v16, %v1372_v24 }
0x1062   :  { %v1382_v26 = vadd.f32 %v2307_v21, %v1377_v25 }
0x1064   :  { %v1388_v27 = vpack.c.bf16 %v1382_v26, %v1381_v18 }
0x1066   :  { %2115 = vmatmul.msk.bf16.vlgmr.msra.gmra.mxu3 %vm171_vm0, %v1388_v27 }
0x10e9   :  { %v1418_v35 = vpop.f32.mrf.mxu3 }
0x10ea   :  { %v1419_v37 = vadd.f32 %v2308_v34, %v1418_v35 }
0x10ec   :  { %v1423_v38 = vmul.f32 %v1419_v37, %v1419_v37 }
0x10ee   :  { %v1425_v39 = vmul.f32 %v1423_v38, %v1419_v37 }
0x10f0   :  { %v1427_v40 = vmul.f32 0.044715, %v1425_v39  ;;  %v1587_v39 = vand.u32 127, %v1586_v31 }
0x10f1   :  { %v1420_v41 = vpop.f32.mrf.mxu3 }
0x10f2   :  { %v1429_v42 = vadd.f32 %v1427_v40, %v1419_v37  ;;  %v1421_v43 = vadd.f32 %v2308_v34, %v1420_v41 }
0x10f4   :  { %v1431_v44 = vmul.f32 0.7978846, %v1429_v42  ;;  %v1424_v45 = vmul.f32 %v1421_v43, %v1421_v43 }
0x10f6   :  { %v1426_v46 = vmul.f32 %v1424_v45, %v1421_v43  ;;  %2372 = vtanh.f32 %v1431_v44 }
0x10f8   :  { %v1428_v47 = vmul.f32 0.044715, %v1426_v46 }
0x10fa   :  { %v1430_v48 = vadd.f32 %v1428_v47, %v1421_v43  ;;  %v2573_v47 = vmov 0.0  }
0x10fc   :  { %v1432_v49 = vmul.f32 0.7978846, %v1430_v48  ;;  %v2373_v50 = vpop.eup %2372 }
0x10fd   :  { %v1435_v51 = vadd.f32 1.0, %v2373_v50 }
0x10fe   :  { %2374 = vtanh.f32 %v1432_v49  ;;  %v2258_v49 = vld [vmem:[#allocation10] sm:$0xff] }
0x10ff   :  { %v1437_v53 = vmul.f32 0.5, %v1435_v51  ;;  %1648 = vmatpush.bf16.msrb.mxu2 %v2258_v49 }
0x1101   :  { %v1439_v60 = vmul.f32 %v1437_v53, %v1419_v37  ;;  %v2260_v53 = vld [vmem:[#allocation10 + $0x10] sm:$0xff] }
0x1104   :  { %v2375_v52 = vpop.eup %2374 }
0x1105   :  { %v1436_v58 = vadd.f32 1.0, %v2375_v52  ;;  %v2261_v52 = vld [vmem:[#allocation10 + $0x18] sm:$0xff] }
0x1106   :  { %1687 = vmatpush.bf16.msrb.mxu3 %v2261_v52 }
0x1107   :  { %v1438_v54 = vmul.f32 0.5, %v1436_v58  ;;  %v2312_v58 = vld [vmem:[%s3048_s12] ss:$0 sm:$0xff] }
0x1109   :  { %v1440_v61 = vmul.f32 %v1438_v54, %v1421_v43  ;;  %v2311_v43 = vld [vmem:[#allocation2 + $0x9] ss:$0 sm:$0xff] }
0x110a   :  { %1688 = vmatpush.bf16.msrb.mxu3 %v2260_v53 }
0x110b   :  { %v1458_v62 = vpack.c.bf16 %v1440_v61, %v1439_v60 }
0x110d   :  { %1520 = vmatmul.bf16.vlgmr.msrb.gmra.mxu0 %v1458_v62 }
0x118a   :  { %v1521_v56 = vpop.f32.mrf.mxu0 }
0x118b   :  { %v1522_v63 = vadd.f32 %v2309_v55, %v1521_v56  ;;  %v2263_v56 = vld [vmem:[#allocation11 + $0x8] sm:$0xff] }
0x118d   :  { %v1526_v0 = vadd.f32 %v1522_v63, %v1381_v18  ;;  %v2262_v63 = vld [vmem:[#allocation11] sm:$0xff] }
0x118f   :  { %v1532_v1 = vsel %vm171_vm0, %v1526_v0, 0.0 }
0x1190   :  { %1533 = vadd.xlane.f32.xlu0 %v1532_v1  ;;  %v2266_v1 = vld [vmem:[%s3051_s15 + $0x10] sm:$0xff] }
0x1192   :  { %v1523_v2 = vpop.f32.mrf.mxu0 }
0x1193   :  { %v1524_v57 = vadd.f32 %v2309_v55, %v1523_v2  ;;  %v2265_v2 = vld [vmem:[%s3051_s15 + $0x8] sm:$0xff] }
0x1195   :  { %v1527_v59 = vadd.f32 %v1524_v57, %v1382_v26  ;;  %v2313_v57 = vld [vmem:[%s3048_s12 + $0x1] ss:$0 sm:$0xff] }
0x1197   :  { %v1535_v3 = vsel %vm171_vm0, %v1527_v59, 0.0 }
0x1198   :  { %1536 = vadd.xlane.f32.xlu2 %v1535_v3 }
0x1203   :  { %v1534_v4 = vpop.xlane.xlu0 %1533 }
0x1204   :  { %v1538_v5 = vmul.f32 %v1534_v4, %v2726_v10 }
0x1206   :  { %v1540_v6 = vsub.f32 %v1526_v0, %v1538_v5  ;;  %v2267_v0 = vld [vmem:[%s3051_s15 + $0x18] sm:$0xff] }
0x1207   :  { %1777 = vmatpush.bf16.msra.mxu2 %v2267_v0 }
0x1208   :  { %v1542_v7 = vmul.f32 %v1540_v6, %v1540_v6 }
0x120a   :  { %v1544_v8 = vsel %vm171_vm0, %v1542_v7, 0.0  ;;  %v2264_v7 = vld [vmem:[%s3051_s15] sm:$0xff] }
0x120b   :  { %v1537_v9 = vpop.xlane.xlu2 %1536  ;;  %1545 = vadd.xlane.f32.xlu2 %v1544_v8  ;;  %1778 = vmatpush.bf16.msra.mxu2 %v2266_v1  ;;  %v2269_v8 = vld [vmem:[%s3053_s17 + $0x8] sm:$0xff] }
0x120c   :  { %v1539_v11 = vmul.f32 %v1537_v9, %v2726_v10  ;;  %1816 = vmatpush.bf16.msra.mxu3 %v2269_v8  ;;  %v2314_v9 = vld [vmem:[%s3050_s14] ss:$0 sm:$0xff] }
0x120e   :  { %v1541_v12 = vsub.f32 %v1527_v59, %v1539_v11 }
0x120f   :  { %1779 = vmatpush.bf16.msra.mxu2 %v2265_v2 }
0x1210   :  { %v1543_v13 = vmul.f32 %v1541_v12, %v1541_v12 }
0x1212   :  { %v1547_v14 = vsel %vm171_vm0, %v1543_v13, 0.0 }
0x1213   :  { %1548 = vadd.xlane.f32.xlu1 %v1547_v14  ;;  %1780 = vmatpush.bf16.msra.mxu2 %v2264_v7 }
0x127e   :  { %v1546_v15 = vpop.xlane.xlu2 %1545 }
0x127f   :  { %v1550_v16 = vmul.f32 %v1546_v15, %v2726_v10  ;;  %v2268_v15 = vld [vmem:[%s3053_s17] sm:$0xff] }
0x1280   :  { %1817 = vmatpush.bf16.msra.mxu3 %v2268_v15 }
0x1281   :  { %v1552_v17 = vadd.f32 1e-12, %v1550_v16  ;;  %v2270_v16 = vld [vmem:[%s3055_s19] sm:$0xff] }
0x1283   :  { %2376 = vrsqrt.f32 %v1552_v17  ;;  %vm1560_vm14 = vweird.f32 %v1552_v17 }
0x1286   :  { %v1549_v19 = vpop.xlane.xlu1 %1548 }
0x1287   :  { %v1551_v21 = vmul.f32 %v1549_v19, %v2726_v10  ;;  %v1589_v10 = vshrl.u32 %v1586_v31, 7 }
0x1289   :  { %v2377_v22 = vpop.eup %2376  ;;  %v1553_v24 = vadd.f32 1e-12, %v1551_v21  ;;  %v1590_v40 = vmul.u32 8, %v1589_v10 }
0x128a   :  { %v1555_v25 = vmul.f32 %v2377_v22, %v1552_v17  ;;  %vm1561_vm13 = vweird.f32 %v2377_v22  ;;  %v2315_v17 = vld [vmem:[%s3052_s16] ss:$0 sm:$0xff]  ;;  %s2574_s16 = smov [#allocation13]  }
0x128b   :  { %2378 = vrsqrt.f32 %v1553_v24  ;;  %vm1562_vm15 = vmor %vm1560_vm14, %vm1561_vm13  ;;  %vm1570_vm2 = vweird.f32 %v1553_v24  ;;  %vm1591_vm4 = vcmp.eq.s32.totalorder %v1587_v39, %v1590_v40  ;;  %s1858_s8 = sshll.u32 %s2574_s16, 4  ;;  %s1859_s8 = int_to_ptr.vmem [resolvable:$true] %s1858_s8 }
0x128c   :  { %v1556_v18 = vmul.f32 %v2377_v22, %v1555_v25  ;;  %v2149_v48 = vsel %vm1591_vm4, 1.0, %v2573_v47 }
0x128e   :  { %v1557_v26 = vmul.f32 0.5, %v1556_v18 }
0x1290   :  { %v1558_v27 = vsub.f32 1.5, %v1557_v26 }
0x1291   :  { %v2379_v23 = vpop.eup %2378 }
0x1292   :  { %v1565_v28 = vmul.f32 %v2379_v23, %v1553_v24  ;;  %v1559_v29 = vmul.f32 %v2377_v22, %v1558_v27  ;;  %vm1571_vm1 = vweird.f32 %v2379_v23  ;;  %v2316_v24 = vld [vmem:[%s3054_s18] ss:$0 sm:$0xff] }
0x1293   :  { %vm1572_vm3 = vmor %vm1570_vm2, %vm1571_vm1 }
0x1294   :  { %v1566_v30 = vmul.f32 %v2379_v23, %v1565_v28  ;;  %v1563_v33 = vsel %vm1562_vm15, %v2377_v22, %v1559_v29 }
0x1295   :  { %v1574_v37 = vmul.f32 %v1563_v33, %v1540_v6 }
0x1296   :  { %v1567_v32 = vmul.f32 0.5, %v1566_v30 }
0x1297   :  { %v1579_v44 = vmul.f32 %v2310_v36, %v1574_v37 }
0x1298   :  { %v1568_v34 = vsub.f32 1.5, %v1567_v32 }
0x1299   :  { %v1584_v46 = vadd.f32 %v2311_v43, %v1579_v44 }
0x129a   :  { %v1569_v35 = vmul.f32 %v2379_v23, %v1568_v34 }
0x129c   :  { %v1573_v38 = vsel %vm1572_vm3, %v2379_v23, %v1569_v35  ;;  %v2317_v23 = vld [vmem:[%s3056_s20] ss:$0 sm:$0xff] }
0x129d   :  { %v1575_v41 = vmul.f32 %v1573_v38, %v1541_v12 }
0x129f   :  { %v1580_v42 = vmul.f32 %v2310_v36, %v1575_v41 }
0x12a1   :  { %v1585_v45 = vadd.f32 %v2311_v43, %v1580_v42 }
0x12a3   :  { %1611 = vmatpush.msra.mxu1 %v1585_v45 }
0x12a5   :  { %1612 = vmatpush.msra.mxu1 %v1584_v46 }
0x12a6   :  { %2150 = vmatmul.msk.f32.vlgmr.msra.gmra.mxu1 %vm346_vm8, %v2149_v48 }
0x12a7   :  { %1725 = vmatpush.bf16.msrb.mxu1 %v2263_v56 }
0x12ab   :  { %1726 = vmatpush.bf16.msrb.mxu1 %v2262_v63 }
0x12af   :  { %1846 = vmatpush.bf16.msra.mxu1 %v2270_v16 }
0x1323   :  { %v1614_v50 = vpop.f32.mrf.mxu1 }
0x1324   :  { %v1621_v51 = vpack.c.bf16 %v1614_v50, %v1614_v50 }
0x1326   :  { %2159 = vmatmul.msk.bf16.vlgmr.msrb.gmra.mxu2 %vm171_vm0, %v1621_v51 }
0x13a9   :  { %v1650_v54 = vpop.f32.mrf.mxu2 }
0x13aa   :  { %v1651_v60 = vadd.f32 %v2312_v58, %v1650_v54 }
0x13ac   :  { %2380 = vtanh.f32 %v1651_v60 }
0x13b1   :  { %v1652_v61 = vpop.f32.mrf.mxu2 }
0x13b2   :  { %v2381_v62 = vpop.eup %2380 }
0x13b3   :  { %v1660_v55 = vpack.c.bf16 %v2381_v62, %v2381_v62 }
0x13b5   :  { %2169 = vmatmul.msk.bf16.vlgmr.msrb.gmra.mxu3 %vm171_vm0, %v1660_v55 }
0x1438   :  { %v1690_v59 = vpop.f32.mrf.mxu3 }
0x1439   :  { %v1691_v3 = vadd.f32 %v2313_v57, %v1690_v59 }
0x143b   :  { %2382 = vtanh.f32 %v1691_v3 }
0x1440   :  { %v1692_v4 = vpop.f32.mrf.mxu3 }
0x1441   :  { %v2383_v5 = vpop.eup %2382 }
0x1442   :  { %v1699_v6 = vpack.c.bf16 %v2383_v5, %v2383_v5 }
0x1444   :  { %2178 = vmatmul.msk.bf16.vlgmr.msrb.gmra.mxu1 %vm171_vm0, %v1699_v6 }
0x14c1   :  { %v1728_v11 = vpop.f32.mrf.mxu1 }
0x14c2   :  { %v1729_v12 = vadd.f32 %v2314_v9, %v1728_v11 }
0x14c4   :  { %v1740_v13 = vpack.c.bf16 %v1729_v12, %v1729_v12 }
0x14c6   :  { %2195 = vmatmul.msk.bf16.vlgmr.msra.gmra.mxu2 %vm1769_vm5, %v1740_v13 }
0x14c9   :  { %v1730_v14 = vpop.f32.mrf.mxu1 }
0x1549   :  { %v1782_v19 = vpop.f32.mrf.mxu2 }
0x154a   :  { %v1783_v20 = vadd.f32 %v2315_v17, %v1782_v19 }
0x154c   :  { %v1790_v21 = vpack.c.bf16 %v1783_v20, %v1783_v20 }
0x154e   :  { %2204 = vmatmul.msk.bf16.vlgmr.msra.gmra.mxu3 %vm171_vm0, %v1790_v21 }
0x1551   :  { %v1784_v22 = vpop.f32.mrf.mxu2 }
0x15d1   :  { %v1819_v25 = vpop.f32.mrf.mxu3 }
0x15d2   :  { %v1820_v18 = vadd.f32 %v2316_v24, %v1819_v25 }
0x15d4   :  { %v1825_v26 = vpack.c.bf16 %v1820_v18, %v1820_v18 }
0x15d6   :  { %2209 = vmatmul.msk.bf16.vlgmr.msra.gmra.mxu1 %vm346_vm8, %v1825_v26 }
0x15d9   :  { %v1821_v27 = vpop.f32.mrf.mxu3 }
0x1653   :  { %v1848_v28 = vpop.f32.mrf.mxu1 }
0x1654   :  { %v1849_v29 = vadd.f32 %v2317_v23, %v1848_v28 }
0x1656   :  { %1852 = vst [vmem:[#allocation13] sm:$0x3] %v1849_v29 }
0x1657   :  { %1863 = dma.vmem_to_hbm [thread:$0]  %s1859_s8, 32, %s1861_s13, [#allocation4]  }
0x165b   :  { %v1850_v30 = vpop.f32.mrf.mxu1 }
0x165c   :  { %2560 = dma.done.wait [#allocation4], 32  }
0x165d   :  { %2561 = vsyncadd [#allocation4], 4294967264 }
0x165e   :  { %1868 = vsyncpa [#allocation3], 1 }
0x165f   :  { %1869 = vsyncpa [#allocation6], 1 }
0x1660   :  { %1870 = vsyncpa [#allocation9], 1 }
0x1661   :  { %1871 = vsyncpa [#allocation12], 1 }
0x1662   :  { %1872 = vsyncpa [#allocation4], 1 }

</bundles_post_ra>
